<compile_context>
chip_gen: v7x
topology: tpu7x:2x2x1
jax: 0.10.0
libtpu: 0.0.40
codegen_flags: <defaults>
</compile_context>

<pallas_src>
import jax
import jax.numpy as jnp
from jax.experimental import pallas as pl
from jax.experimental.pallas import tpu as pltpu


def _round_up(a, b):
    return (a + b - 1) // b * b


def _up_phase_matmul_kernel(a_ref, ar_ref, ad_ref, adr_ref,
                            wa_ref, wr_ref, wd_ref, wdr_ref, b_ref, o_ref):
    # a*:   (tm, IC)  bf16 neighbor-tap streams
    # w*:   (IC, 4*OC) bf16 phase-packed weights (zeros where a tap doesn't hit)
    # b:    (1, 4*OC)  f32 bias (tiled over the 4 phases)
    # o:    (tm, 4*OC) f32 phase-packed output [ee | eo | oe | oo]
    acc = jnp.dot(a_ref[...], wa_ref[...], preferred_element_type=jnp.float32)
    acc += jnp.dot(ar_ref[...], wr_ref[...], preferred_element_type=jnp.float32)
    acc += jnp.dot(ad_ref[...], wd_ref[...], preferred_element_type=jnp.float32)
    acc += jnp.dot(adr_ref[...], wdr_ref[...], preferred_element_type=jnp.float32)
    o_ref[...] = (acc + b_ref[...]).astype(o_ref.dtype)


def conv_transpose2d_pallas(x_nchw, w_ct, bias, *, tm=1024):
    """PyTorch ConvTranspose2d(ic, oc, 3, stride=2, padding=1, output_padding=1).

    x_nchw: (N, IC, H, W); w_ct: (IC, OC, 3, 3) (PyTorch layout); bias: (OC,).
    Returns (N, OC, 2*H, 2*W).

    Sub-pixel decomposition (oy = 2*iy - 1 + ky, ox = 2*ix - 1 + kx):
      out[2i  , 2j  ] = x[i,j]@w11
      out[2i  , 2j+1] = x[i,j]@w12 + x[i,j+1]@w10
      out[2i+1, 2j  ] = x[i,j]@w21 + x[i+1,j]@w01
      out[2i+1, 2j+1] = x[i,j]@w22 + x[i,j+1]@w20 + x[i+1,j]@w02 + x[i+1,j+1]@w00
    with out-of-range neighbors = 0 (this is exactly padding=1, output_padding=1).
    """
    N, IC, H, W = x_nchw.shape
    IC2, OC, kH, kW = w_ct.shape
    assert IC == IC2 and kH == 3 and kW == 3
    Hout, Wout = 2 * H, 2 * W

    cdt = jnp.bfloat16  # MXU operand dtype; accumulation stays f32

    # --- glue: NHWC + the 4 neighbor-tap streams (zero past the bottom/right edge)
    x = jnp.transpose(x_nchw, (0, 2, 3, 1)).astype(cdt)          # (N, H, W, IC)
    z = jnp.zeros((), cdt)
    x_r = jax.lax.pad(x[:, :, 1:, :], z, ((0, 0, 0), (0, 0, 0), (0, 1, 0), (0, 0, 0)))
    x_d = jax.lax.pad(x[:, 1:, :, :], z, ((0, 0, 0), (0, 1, 0), (0, 0, 0), (0, 0, 0)))
    x_dr = jax.lax.pad(x[:, 1:, 1:, :], z, ((0, 0, 0), (0, 1, 0), (0, 1, 0), (0, 0, 0)))

    M = N * H * W
    taps = [t.reshape(M, IC) for t in (x, x_r, x_d, x_dr)]

    # --- glue: phase-packed weights, phase order [ee, eo, oe, oo]
    w = w_ct.astype(cdt)                                          # (IC, OC, 3, 3)
    zc = jnp.zeros((IC, OC), cdt)
    W_a = jnp.concatenate([w[:, :, 1, 1], w[:, :, 1, 2], w[:, :, 2, 1], w[:, :, 2, 2]], axis=1)
    W_r = jnp.concatenate([zc,            w[:, :, 1, 0], zc,            w[:, :, 2, 0]], axis=1)
    W_d = jnp.concatenate([zc,            zc,            w[:, :, 0, 1], w[:, :, 0, 2]], axis=1)
    W_dr = jnp.concatenate([zc,           zc,            zc,            w[:, :, 0, 0]], axis=1)
    bias4 = jnp.tile(bias.astype(jnp.float32), 4).reshape(1, 4 * OC)

    # --- row tiling
    tm_eff = min(tm, _round_up(M, 8))
    Mp = _round_up(M, tm_eff)
    if Mp != M:
        taps = [jnp.pad(t, ((0, Mp - M), (0, 0))) for t in taps]

    lhs_specs = [pl.BlockSpec((tm_eff, IC), lambda i: (i, 0)) for _ in range(4)]
    w_specs = [pl.BlockSpec((IC, 4 * OC), lambda i: (0, 0)) for _ in range(4)]
    b_spec = pl.BlockSpec((1, 4 * OC), lambda i: (0, 0))

    out = pl.pallas_call(
        _up_phase_matmul_kernel,
        out_shape=jax.ShapeDtypeStruct((Mp, 4 * OC), jnp.float32),
        grid_spec=pltpu.PrefetchScalarGridSpec(
            num_scalar_prefetch=0,
            grid=(Mp // tm_eff,),
            in_specs=lhs_specs + w_specs + [b_spec],
            out_specs=pl.BlockSpec((tm_eff, 4 * OC), lambda i: (i, 0)),
        ),
        compiler_params=pltpu.CompilerParams(
            dimension_semantics=("parallel",),
            vmem_limit_bytes=64 * 1024 * 1024,
        ),
    )(*taps, W_a, W_r, W_d, W_dr, bias4)

    # --- glue: unpack phases (pixel shuffle) and go back to NCHW in one transpose
    out = out[:M].reshape(N, H, W, 2, 2, OC)          # (n, i, j, dy, dx, oc)
    out = jnp.transpose(out, (0, 5, 1, 3, 2, 4))      # (n, oc, i, dy, j, dx)
    return out.reshape(N, OC, Hout, Wout)


def up_forward(x1, x2, w_ct, bias):
    # Up.forward with transformer=None
    # TODO(synk): the `transformer` callback is an external module; only the
    # transformer-is-None branch is implemented here.
    x1u = conv_transpose2d_pallas(x1, w_ct, bias)
    h_diff = x2.shape[2] - x1u.shape[2]
    w_diff = x2.shape[3] - x1u.shape[3]
    x1p = jnp.pad(x1u, ((0, 0), (0, 0),
                        (h_diff // 2, h_diff - h_diff // 2),
                        (w_diff // 2, w_diff - w_diff // 2)))
    return jnp.concatenate([x2, x1p], axis=1)


if __name__ == "__main__":
    key = jax.random.PRNGKey(0)
    k1, k2, k3, k4 = jax.random.split(key, 4)

    N, IC, OC, H, W = 2, 4, 4, 16, 16
    x1 = jax.random.normal(k1, (N, IC, H, W), jnp.float32)
    # x2 slightly larger spatially so the F.pad branch is exercised (h_diff = w_diff = 2)
    x2 = jax.random.normal(k2, (N, OC, 2 * H + 2, 2 * W + 2), jnp.float32)

    # deterministic parameter init (ConvTranspose2d weight: (IC, OC, 3, 3), bias: (OC,))
    bound = 1.0 / (IC * 3 * 3) ** 0.5
    w_ct = jax.random.uniform(k3, (IC, OC, 3, 3), jnp.float32, -bound, bound)
    bias = jax.random.uniform(k4, (OC,), jnp.float32, -bound, bound)

    res = jax.jit(up_forward)(x1, x2, w_ct, bias)
    res = jax.block_until_ready(res)

    # reference check: transposed conv via XLA dilated conv, then same pad + concat
    w_oihw = jnp.transpose(jnp.flip(w_ct, (2, 3)), (1, 0, 2, 3))
    ref_up = jax.lax.conv_general_dilated(
        x1, w_oihw, window_strides=(1, 1), padding=((1, 2), (1, 2)),
        lhs_dilation=(2, 2), dimension_numbers=("NCHW", "OIHW", "NCHW"),
        precision=jax.lax.Precision.HIGHEST) + bias[None, :, None, None]
    hd = x2.shape[2] - ref_up.shape[2]
    wd = x2.shape[3] - ref_up.shape[3]
    ref_up = jnp.pad(ref_up, ((0, 0), (0, 0),
                              (hd // 2, hd - hd // 2), (wd // 2, wd - wd // 2)))
    ref = jnp.concatenate([x2, ref_up], axis=1)

    assert res.shape == ref.shape == (N, 2 * OC, 2 * H + 2, 2 * W + 2)
    # bf16 MXU operands with f32 accumulation -> slightly looser tolerance
    assert jnp.allclose(res, ref, atol=3e-2, rtol=3e-2)
    print("KERNEL_OK")
</pallas_src>

<mosaic_0001>
module attributes {stable_mosaic.version = 11 : i64} {
  func.func @_up_phase_matmul_kernel(%arg0: i32, %arg1: memref<512x4xbf16, #tpu.memory_space<vmem>>, %arg2: memref<512x4xbf16, #tpu.memory_space<vmem>>, %arg3: memref<512x4xbf16, #tpu.memory_space<vmem>>, %arg4: memref<512x4xbf16, #tpu.memory_space<vmem>>, %arg5: memref<4x16xbf16, #tpu.memory_space<vmem>>, %arg6: memref<4x16xbf16, #tpu.memory_space<vmem>>, %arg7: memref<4x16xbf16, #tpu.memory_space<vmem>>, %arg8: memref<4x16xbf16, #tpu.memory_space<vmem>>, %arg9: memref<1x16xf32, #tpu.memory_space<vmem>>, %arg10: memref<512x16xf32, #tpu.memory_space<vmem>>) attributes {dimension_semantics = [#tpu.dimension_semantics<parallel>], iteration_bounds = array<i64: 1>, scalar_prefetch = 0 : i64, scratch_operands = 0 : i64, tpu.core_type = #tpu.core_type<tc>, window_params = [{transform_indices = @transform_0, window_bounds = array<i64: 512, 4>}, {transform_indices = @transform_1, window_bounds = array<i64: 512, 4>}, {transform_indices = @transform_2, window_bounds = array<i64: 512, 4>}, {transform_indices = @transform_3, window_bounds = array<i64: 512, 4>}, {pipeline_mode = #tpu.pipeline_mode<synchronous>, transform_indices = @transform_4, window_bounds = array<i64: 4, 16>}, {pipeline_mode = #tpu.pipeline_mode<synchronous>, transform_indices = @transform_5, window_bounds = array<i64: 4, 16>}, {pipeline_mode = #tpu.pipeline_mode<synchronous>, transform_indices = @transform_6, window_bounds = array<i64: 4, 16>}, {pipeline_mode = #tpu.pipeline_mode<synchronous>, transform_indices = @transform_7, window_bounds = array<i64: 4, 16>}, {pipeline_mode = #tpu.pipeline_mode<synchronous>, transform_indices = @transform_8, window_bounds = array<i64: 1, 16>}, {transform_indices = @transform_9, window_bounds = array<i64: 512, 16>}]} {
    %c0 = arith.constant 0 : index
    %c0_0 = arith.constant 0 : index
    %0 = vector.load %arg1[%c0, %c0_0] : memref<512x4xbf16, #tpu.memory_space<vmem>>, vector<512x4xbf16>
    %c0_1 = arith.constant 0 : index
    %c0_2 = arith.constant 0 : index
    %1 = vector.load %arg5[%c0_1, %c0_2] : memref<4x16xbf16, #tpu.memory_space<vmem>>, vector<4x16xbf16>
    %cst = arith.constant dense<0.000000e+00> : vector<512x16xf32>
    %2 = tpu.matmul %0, %1, %cst {dimension_numbers = #tpu.dot_dimension_numbers<[1], [0], [0], [1], [0, 0, 1, 1], [], []>} : vector<512x4xbf16>, vector<4x16xbf16>, vector<512x16xf32> -> vector<512x16xf32>
    %c0_3 = arith.constant 0 : index
    %c0_4 = arith.constant 0 : index
    %3 = vector.load %arg2[%c0_3, %c0_4] : memref<512x4xbf16, #tpu.memory_space<vmem>>, vector<512x4xbf16>
    %c0_5 = arith.constant 0 : index
    %c0_6 = arith.constant 0 : index
    %4 = vector.load %arg6[%c0_5, %c0_6] : memref<4x16xbf16, #tpu.memory_space<vmem>>, vector<4x16xbf16>
    %cst_7 = arith.constant dense<0.000000e+00> : vector<512x16xf32>
    %5 = tpu.matmul %3, %4, %cst_7 {dimension_numbers = #tpu.dot_dimension_numbers<[1], [0], [0], [1], [0, 0, 1, 1], [], []>} : vector<512x4xbf16>, vector<4x16xbf16>, vector<512x16xf32> -> vector<512x16xf32>
    %6 = arith.addf %2, %5 : vector<512x16xf32>
    %c0_8 = arith.constant 0 : index
    %c0_9 = arith.constant 0 : index
    %7 = vector.load %arg3[%c0_8, %c0_9] : memref<512x4xbf16, #tpu.memory_space<vmem>>, vector<512x4xbf16>
    %c0_10 = arith.constant 0 : index
    %c0_11 = arith.constant 0 : index
    %8 = vector.load %arg7[%c0_10, %c0_11] : memref<4x16xbf16, #tpu.memory_space<vmem>>, vector<4x16xbf16>
    %cst_12 = arith.constant dense<0.000000e+00> : vector<512x16xf32>
    %9 = tpu.matmul %7, %8, %cst_12 {dimension_numbers = #tpu.dot_dimension_numbers<[1], [0], [0], [1], [0, 0, 1, 1], [], []>} : vector<512x4xbf16>, vector<4x16xbf16>, vector<512x16xf32> -> vector<512x16xf32>
    %10 = arith.addf %6, %9 : vector<512x16xf32>
    %c0_13 = arith.constant 0 : index
    %c0_14 = arith.constant 0 : index
    %11 = vector.load %arg4[%c0_13, %c0_14] : memref<512x4xbf16, #tpu.memory_space<vmem>>, vector<512x4xbf16>
    %c0_15 = arith.constant 0 : index
    %c0_16 = arith.constant 0 : index
    %12 = vector.load %arg8[%c0_15, %c0_16] : memref<4x16xbf16, #tpu.memory_space<vmem>>, vector<4x16xbf16>
    %cst_17 = arith.constant dense<0.000000e+00> : vector<512x16xf32>
    %13 = tpu.matmul %11, %12, %cst_17 {dimension_numbers = #tpu.dot_dimension_numbers<[1], [0], [0], [1], [0, 0, 1, 1], [], []>} : vector<512x4xbf16>, vector<4x16xbf16>, vector<512x16xf32> -> vector<512x16xf32>
    %14 = arith.addf %10, %13 : vector<512x16xf32>
    %c0_18 = arith.constant 0 : index
    %c0_19 = arith.constant 0 : index
    %15 = vector.load %arg9[%c0_18, %c0_19] : memref<1x16xf32, #tpu.memory_space<vmem>>, vector<1x16xf32>
    %16 = vector.broadcast %15 : vector<1x16xf32> to vector<512x16xf32>
    %17 = arith.addf %14, %16 : vector<512x16xf32>
    %c0_20 = arith.constant 0 : index
    %c0_21 = arith.constant 0 : index
    %18 = vector.load %arg10[%c0_20, %c0_21] : memref<512x16xf32, #tpu.memory_space<vmem>>, vector<512x16xf32>
    tpu.vector_store %arg10[%c0_20, %c0_21], %17 {strides = array<i32>} : memref<512x16xf32, #tpu.memory_space<vmem>>, vector<512x16xf32>,
    return
  }
  func.func @transform_0(%arg0: i32) -> (i32, i32) {
    %c0_i32 = arith.constant 0 : i32
    %c0_i32_0 = arith.constant 0 : i32
    return %arg0, %c0_i32 : i32, i32
  }
  func.func @transform_1(%arg0: i32) -> (i32, i32) {
    %c0_i32 = arith.constant 0 : i32
    %c0_i32_0 = arith.constant 0 : i32
    return %arg0, %c0_i32 : i32, i32
  }
  func.func @transform_2(%arg0: i32) -> (i32, i32) {
    %c0_i32 = arith.constant 0 : i32
    %c0_i32_0 = arith.constant 0 : i32
    return %arg0, %c0_i32 : i32, i32
  }
  func.func @transform_3(%arg0: i32) -> (i32, i32) {
    %c0_i32 = arith.constant 0 : i32
    %c0_i32_0 = arith.constant 0 : i32
    return %arg0, %c0_i32 : i32, i32
  }
  func.func @transform_4(%arg0: i32) -> (i32, i32) {
    %c0_i32 = arith.constant 0 : i32
    %c0_i32_0 = arith.constant 0 : i32
    %c0_i32_1 = arith.constant 0 : i32
    return %c0_i32, %c0_i32_0 : i32, i32
  }
  func.func @transform_5(%arg0: i32) -> (i32, i32) {
    %c0_i32 = arith.constant 0 : i32
    %c0_i32_0 = arith.constant 0 : i32
    %c0_i32_1 = arith.constant 0 : i32
    return %c0_i32, %c0_i32_0 : i32, i32
  }
  func.func @transform_6(%arg0: i32) -> (i32, i32) {
    %c0_i32 = arith.constant 0 : i32
    %c0_i32_0 = arith.constant 0 : i32
    %c0_i32_1 = arith.constant 0 : i32
    return %c0_i32, %c0_i32_0 : i32, i32
  }
  func.func @transform_7(%arg0: i32) -> (i32, i32) {
    %c0_i32 = arith.constant 0 : i32
    %c0_i32_0 = arith.constant 0 : i32
    %c0_i32_1 = arith.constant 0 : i32
    return %c0_i32, %c0_i32_0 : i32, i32
  }
  func.func @transform_8(%arg0: i32) -> (i32, i32) {
    %c0_i32 = arith.constant 0 : i32
    %c0_i32_0 = arith.constant 0 : i32
    %c0_i32_1 = arith.constant 0 : i32
    return %c0_i32, %c0_i32_0 : i32, i32
  }
  func.func @transform_9(%arg0: i32) -> (i32, i32) {
    %c0_i32 = arith.constant 0 : i32
    %c0_i32_0 = arith.constant 0 : i32
    return %arg0, %c0_i32 : i32, i32
  }
}

</mosaic_0001>

<bundles_post_ra>
// kernel: tile.8
= control target key start
LH: loop header
LB: loop body
LE: loop exit
PB: predicated region body
PF: predicated region fallthrough
CT: control target
= control target key end

     0   :  { %s22_s0 = inlined_call_operand.vmem [shape: f32[4], index: 0, kind: input, shape index: {}]   ;;  %s23_s1 = inlined_call_operand.vmem [shape: f32[4,4], index: 1, kind: output, shape index: {}]  }
   0x1   :  { %v4_v0 = vld [vmem:[%s22_s0] ss:$0 sm:$0xff] }
   0x2   :  { %5 = vst [vmem:[%s23_s1] sm:$0xf] %v4_v0 }

// kernel: tile.9
= control target key start
LH: loop header
LB: loop body
LE: loop exit
PB: predicated region body
PF: predicated region fallthrough
CT: control target
= control target key end

     0   :  { %s101_s0 = inlined_call_operand.vmem [shape: f32[4,4], index: 0, kind: input, shape index: {}]   ;;  %s102_s1 = inlined_call_operand.hbm [shape: f32[1,16], index: 1, kind: output, shape index: {}]  }
   0x1   :  { %v5_v0 = vld [vmem:[%s101_s0] sm:$0xf] }
   0x2   :  { %6 = vst [vmem:[#allocation3] sm:$0xf] %v5_v0 }
   0x3   :  { %2 = vsyncpa [#allocation1], 0  ;;  %vm8_vm0 = vcmask 31744   ;;  %s72_s0 = smov 12   ;;  %s73_s8 = smov 4   ;;  %vm14_vm1 = vcmask 130144  }
   0x4   :  { %s74_s9 = smov 8   ;;  %vm20_vm2 = vcmask 97344   ;;  %vm26_vm3 = vcmask 64544   ;;  %s75_s10 = smov [#allocation0]  }
   0x5   :  { %s38_s11 = sshll.u32 %s75_s10, 4  ;;  %s39_s11 = int_to_ptr.vmem [resolvable:$true] %s38_s11 }
   0x6   :  { %s48_s12 = scalar_lea.vmem %s39_s11, 16  ;;  %s52_s13 = scalar_lea.vmem %s39_s11, 32 }
   0x7   :  { %p49_p0 = scmp.ne.s32.totalorder %s39_s11, %s48_s12  ;;  %p53_p1 = scmp.lt.s32.totalorder %s39_s11, %s39_s11 }
   0x8   :  { %p54_p2 = scmp.lt.s32.totalorder %s52_s13, %s48_s12 }
   0x9   :  { %v11_v1 = vld [vmem:[#allocation3 + $0x3] sm:$0x1]   ;;  %v23_v2 = vld [vmem:[#allocation3 + $0x1] sm:$0x1]   ;;  %v7_v3 = vld [vmem:[#allocation3] sm:$0x1]  }
   0xa   :  { %12 = vrot.lane.b32.xlu0 %v11_v1, %s72_s0  ;;  %24 = vrot.lane.b32.xlu1 %v23_v2, %s73_s8  ;;  %v17_v4 = vld [vmem:[#allocation3 + $0x2] sm:$0x1]   ;;  %9 = vst.msk [vmem:[#allocation2] sm:$0x1] %vm8_vm0, %v7_v3   ;;  %p55_p3 = por %p54_p2, %p53_p1 }
   0xc   :  { %p56_p4 = pnand %p55_p3, %p49_p0 }
   0xe   :  { %18 = vrot.lane.b32.xlu0 %v17_v4, %s74_s9 }
  0x7c   :  { %v13_v5 = vpop.permute.xlu0 %12   ;;  %v25_v6 = vpop.permute.xlu1 %24  }
  0x7d   :  { %15 = vst.msk [vmem:[#allocation2] sm:$0x1] %vm14_vm1, %v13_v5  }
  0x80   :  { %v19_v7 = vpop.permute.xlu0 %18  }
  0x81   :  { %21 = vst.msk [vmem:[#allocation2] sm:$0x1] %vm20_vm2, %v19_v7  }
  0x82   :  { %27 = vst.msk [vmem:[#allocation2] sm:$0x1] %vm26_vm3, %v25_v6  }
  0x89   :  { %v31_v8 = vld [vmem:[#allocation2] sm:$0x1] }
  0x8a   :  { %33 = vst [vmem:[#allocation0] sm:$0x1] %v31_v8 }
  0x8b   :  { %59 = shalt.err (!%p56_p4)
}
  0x8c   :  { %s60_s16 = scalar_lea.hbm %s102_s1, 16 }
  0x8d   :  { %p61_p5 = scmp.ne.s32.totalorder %s102_s1, %s60_s16  ;;  %p64_p6 = scmp.lt.u32.totalorder %s60_s16, %s102_s1 }
  0x8f   :  { %p66_p7 = pnand %p64_p6, %p61_p5 }
  0x91   :  { %69 = shalt.err (!%p66_p7)
}
  0x92   :  { %41 = dma.vmem_to_hbm [thread:$0]  %s39_s11, 16, %s102_s1, [#allocation1]  }
  0x93   :  { %70 = dma.done.wait [#allocation1], 16  }
  0x94   :  { %71 = vsyncadd [#allocation1], 4294967280 }
  0x95   :  { %43 = vsyncpa [#allocation1], 1 }

// kernel: up_forward.1
= control target key start
LH: loop header
LB: loop body
LE: loop exit
PB: predicated region body
PF: predicated region fallthrough
CT: control target
= control target key end

     0   :  { %14 = vsyncpa [#allocation3], 0  ;;  %s4584_s0 = inlined_call_operand.hbm [shape: bf16[512,4], index: 0, kind: input, shape index: {}]   ;;  %s4585_s1 = inlined_call_operand.hbm [shape: bf16[512,4], index: 1, kind: input, shape index: {}]   ;;  %s4586_s2 = inlined_call_operand.hbm [shape: bf16[512,4], index: 2, kind: input, shape index: {}]   ;;  %s4587_s3 = inlined_call_operand.hbm [shape: bf16[512,4], index: 3, kind: input, shape index: {}]   ;;  %s4588_s4 = inlined_call_operand.hbm [shape: bf16[4,16], index: 4, kind: input, shape index: {}]   ;;  %s4589_s5 = inlined_call_operand.hbm [shape: bf16[4,16], index: 5, kind: input, shape index: {}]   ;;  %s4590_s6 = inlined_call_operand.hbm [shape: bf16[4,16], index: 6, kind: input, shape index: {}]   ;;  %s4591_s7 = inlined_call_operand.hbm [shape: bf16[4,16], index: 7, kind: input, shape index: {}]   ;;  %s4592_s8 = inlined_call_operand.hbm [shape: f32[1,16], index: 8, kind: input, shape index: {}]   ;;  %s4593_s9 = inlined_call_operand.hbm [shape: f32[512,16], index: 9, kind: output, shape index: {}]  }
   0x1   :  { %15 = vsyncpa [#allocation6], 0 }
   0x2   :  { %16 = vsyncpa [#allocation9], 0 }
   0x3   :  { %17 = vsyncpa [#allocation12], 0 }
   0x4   :  { %18 = vsyncpa [#allocation15], 0 }
   0x5   :  { %19 = vsyncpa [#allocation4], 0  ;;  %s4108_s30 = smov [#allocation5]   ;;  %s4109_s11 = smov [#allocation8]  }
   0x6   :  { %s37_s10 = sshll.u32 %s4108_s30, 4  ;;  %s61_s12 = sshll.u32 %s4109_s11, 4  ;;  %s38_s10 = int_to_ptr.vmem [resolvable:$true] %s37_s10  ;;  %s4172_s12 = int_to_ptr.vmem [resolvable:$true] %s61_s12 }
   0x7   :  { %s3876_s15 = scalar_lea.hbm %s4585_s1, 4096 }
   0x8   :  { %p3877_p0 = scmp.ne.s32.totalorder %s4585_s1, %s3876_s15  ;;  %p3880_p1 = scmp.lt.u32.totalorder %s3876_s15, %s4585_s1 }
   0xa   :  { %p3882_p2 = pnand %p3880_p1, %p3877_p0 }
   0xc   :  { %3885 = shalt.err (!%p3882_p2)
}
   0xd   :  { %s3886_s20 = scalar_lea.vmem %s38_s10, 4096  ;;  %p3891_p4 = scmp.lt.s32.totalorder %s38_s10, %s38_s10 }
   0xe   :  { %p3887_p3 = scmp.ne.s32.totalorder %s38_s10, %s3886_s20  ;;  %p3892_p5 = scmp.lt.s32.totalorder %s3886_s20, %s3886_s20 }
  0x10   :  { %p3893_p6 = por %p3892_p5, %p3891_p4 }
  0x12   :  { %p3894_p7 = pnand %p3893_p6, %p3887_p3 }
  0x14   :  { %3897 = shalt.err (!%p3894_p7)
}
  0x15   :  { %s4110_s21 = smov 64   ;;  %s4111_s22 = smov 4  }
  0x16   :  { %43 = dma.hbm_to_vmem [thread:$0]  %s4585_s1, 4096, %s38_s10, [#allocation6], %s4110_s21, %s4110_s21, %s4111_s22  }
  0x17   :  { %s3898_s27 = scalar_lea.hbm %s4587_s3, 4096 }
  0x18   :  { %p3899_p8 = scmp.ne.s32.totalorder %s4587_s3, %s3898_s27  ;;  %p3902_p9 = scmp.lt.u32.totalorder %s3898_s27, %s4587_s3 }
  0x1a   :  { %p3904_p10 = pnand %p3902_p9, %p3899_p8 }
  0x1c   :  { %3907 = shalt.err (!%p3904_p10)
}
  0x1d   :  { %s3908_s13 = scalar_lea.vmem %s4172_s12, 4096  ;;  %p3913_p12 = scmp.lt.s32.totalorder %s4172_s12, %s4172_s12 }
  0x1e   :  { %p3909_p11 = scmp.ne.s32.totalorder %s4172_s12, %s3908_s13  ;;  %p3914_p13 = scmp.lt.s32.totalorder %s3908_s13, %s3908_s13 }
  0x20   :  { %p3915_p0 = por %p3914_p13, %p3913_p12 }
  0x22   :  { %p3916_p1 = pnand %p3915_p0, %p3909_p11 }
  0x24   :  { %3919 = shalt.err (!%p3916_p1)
}
  0x25   :  { %67 = dma.hbm_to_vmem [thread:$0]  %s4587_s3, 4096, %s4172_s12, [#allocation9], %s4110_s21, %s4110_s21, %s4111_s22  }
  0x26   :  { %s4112_s14 = smov [#allocation11]   ;;  %s4113_s16 = smov [#allocation14]  }
  0x27   :  { %s84_s15 = sshll.u32 %s4112_s14, 4  ;;  %s104_s17 = sshll.u32 %s4113_s16, 4  ;;  %s85_s15 = int_to_ptr.vmem [resolvable:$true] %s84_s15  ;;  %s105_s17 = int_to_ptr.vmem [resolvable:$true] %s104_s17 }
  0x28   :  { %s3920_s20 = scalar_lea.hbm %s4589_s5, 32 }
  0x29   :  { %p3921_p2 = scmp.ne.s32.totalorder %s4589_s5, %s3920_s20  ;;  %p3924_p3 = scmp.lt.u32.totalorder %s3920_s20, %s4589_s5 }
  0x2b   :  { %p3926_p4 = pnand %p3924_p3, %p3921_p2 }
  0x2d   :  { %3929 = shalt.err (!%p3926_p4)
}
  0x2e   :  { %s3930_s3 = scalar_lea.vmem %s85_s15, 32  ;;  %p3935_p6 = scmp.lt.s32.totalorder %s85_s15, %s85_s15 }
  0x2f   :  { %p3931_p5 = scmp.ne.s32.totalorder %s85_s15, %s3930_s3  ;;  %p3936_p7 = scmp.lt.s32.totalorder %s3930_s3, %s3930_s3 }
  0x31   :  { %p3937_p8 = por %p3936_p7, %p3935_p6 }
  0x33   :  { %p3938_p9 = pnand %p3937_p8, %p3931_p5 }
  0x35   :  { %3941 = shalt.err (!%p3938_p9)
}
  0x36   :  { %87 = dma.hbm_to_vmem [thread:$0]  %s4589_s5, 32, %s85_s15, [#allocation12]  }
  0x37   :  { %s3942_s30 = scalar_lea.hbm %s4591_s7, 32 }
  0x38   :  { %p3943_p10 = scmp.ne.s32.totalorder %s4591_s7, %s3942_s30  ;;  %p3946_p11 = scmp.lt.u32.totalorder %s3942_s30, %s4591_s7 }
  0x3a   :  { %p3948_p12 = pnand %p3946_p11, %p3943_p10 }
  0x3c   :  { %3951 = shalt.err (!%p3948_p12)
}
  0x3d   :  { %s3952_s14 = scalar_lea.vmem %s105_s17, 32  ;;  %p3957_p0 = scmp.lt.s32.totalorder %s105_s17, %s105_s17 }
  0x3e   :  { %p3953_p13 = scmp.ne.s32.totalorder %s105_s17, %s3952_s14  ;;  %p3958_p1 = scmp.lt.s32.totalorder %s3952_s14, %s3952_s14 }
  0x40   :  { %p3959_p2 = por %p3958_p1, %p3957_p0 }
  0x42   :  { %p3960_p3 = pnand %p3959_p2, %p3953_p13 }
  0x44   :  { %3963 = shalt.err (!%p3960_p3)
}
  0x45   :  { %107 = dma.hbm_to_vmem [thread:$0]  %s4591_s7, 32, %s105_s17, [#allocation15]  }
  0x46   :  { %s4114_s16 = smov [#allocation2]   ;;  %s4115_s19 = smov [#allocation7]  }
  0x47   :  { %s25_s18 = sshll.u32 %s4114_s16, 4  ;;  %s49_s20 = sshll.u32 %s4115_s19, 4  ;;  %s26_s18 = int_to_ptr.vmem [resolvable:$true] %s25_s18  ;;  %s4233_s20 = int_to_ptr.vmem [resolvable:$true] %s49_s20 }
  0x48   :  { %s3964_s25 = scalar_lea.hbm %s4584_s0, 4096 }
  0x49   :  { %p3965_p4 = scmp.ne.s32.totalorder %s4584_s0, %s3964_s25  ;;  %p3968_p5 = scmp.lt.u32.totalorder %s3964_s25, %s4584_s0 }
  0x4b   :  { %p3970_p6 = pnand %p3968_p5, %p3965_p4 }
  0x4d   :  { %3973 = shalt.err (!%p3970_p6)
}
  0x4e   :  { %s3974_s7 = scalar_lea.vmem %s26_s18, 4096  ;;  %p3979_p8 = scmp.lt.s32.totalorder %s26_s18, %s26_s18 }
  0x4f   :  { %p3975_p7 = scmp.ne.s32.totalorder %s26_s18, %s3974_s7  ;;  %p3980_p9 = scmp.lt.s32.totalorder %s3974_s7, %s3974_s7 }
  0x51   :  { %p3981_p10 = por %p3980_p9, %p3979_p8 }
  0x53   :  { %p3982_p11 = pnand %p3981_p10, %p3975_p7 }
  0x55   :  { %3985 = shalt.err (!%p3982_p11)
}
  0x56   :  { %31 = dma.hbm_to_vmem [thread:$0]  %s4584_s0, 4096, %s26_s18, [#allocation3], %s4110_s21, %s4110_s21, %s4111_s22  }
  0x57   :  { %s3986_s11 = scalar_lea.hbm %s4586_s2, 4096 }
  0x58   :  { %p3987_p12 = scmp.ne.s32.totalorder %s4586_s2, %s3986_s11  ;;  %p3990_p13 = scmp.lt.u32.totalorder %s3986_s11, %s4586_s2 }
  0x5a   :  { %p3992_p0 = pnand %p3990_p13, %p3987_p12 }
  0x5c   :  { %3995 = shalt.err (!%p3992_p0)
}
  0x5d   :  { %s3996_s5 = scalar_lea.vmem %s4233_s20, 4096  ;;  %p4001_p2 = scmp.lt.s32.totalorder %s4233_s20, %s4233_s20 }
  0x5e   :  { %p3997_p1 = scmp.ne.s32.totalorder %s4233_s20, %s3996_s5  ;;  %p4002_p3 = scmp.lt.s32.totalorder %s3996_s5, %s3996_s5 }
  0x60   :  { %p4003_p4 = por %p4002_p3, %p4001_p2 }
  0x62   :  { %p4004_p5 = pnand %p4003_p4, %p3997_p1 }
  0x64   :  { %4007 = shalt.err (!%p4004_p5)
}
  0x65   :  { %55 = dma.hbm_to_vmem [thread:$0]  %s4586_s2, 4096, %s4233_s20, [#allocation6], %s4110_s21, %s4110_s21, %s4111_s22  }
  0x66   :  { %s4116_s16 = smov [#allocation10]   ;;  %s4117_s19 = smov [#allocation13]  }
  0x67   :  { %s74_s18 = sshll.u32 %s4116_s16, 4  ;;  %s94_s23 = sshll.u32 %s4117_s19, 4  ;;  %s75_s18 = int_to_ptr.vmem [resolvable:$true] %s74_s18  ;;  %s95_s23 = int_to_ptr.vmem [resolvable:$true] %s94_s23 }
  0x68   :  { %s4008_s26 = scalar_lea.hbm %s4588_s4, 32 }
  0x69   :  { %p4009_p6 = scmp.ne.s32.totalorder %s4588_s4, %s4008_s26  ;;  %p4012_p7 = scmp.lt.u32.totalorder %s4008_s26, %s4588_s4 }
  0x6b   :  { %p4014_p8 = pnand %p4012_p7, %p4009_p6 }
  0x6d   :  { %4017 = shalt.err (!%p4014_p8)
}
  0x6e   :  { %s4018_s2 = scalar_lea.vmem %s75_s18, 32  ;;  %p4023_p10 = scmp.lt.s32.totalorder %s75_s18, %s75_s18 }
  0x6f   :  { %p4019_p9 = scmp.ne.s32.totalorder %s75_s18, %s4018_s2  ;;  %p4024_p11 = scmp.lt.s32.totalorder %s4018_s2, %s4018_s2 }
  0x71   :  { %p4025_p12 = por %p4024_p11, %p4023_p10 }
  0x73   :  { %p4026_p13 = pnand %p4025_p12, %p4019_p9 }
  0x75   :  { %4029 = shalt.err (!%p4026_p13)
}
  0x76   :  { %77 = dma.hbm_to_vmem [thread:$0]  %s4588_s4, 32, %s75_s18, [#allocation9]  }
  0x77   :  { %s4030_s28 = scalar_lea.hbm %s4590_s6, 32 }
  0x78   :  { %p4031_p0 = scmp.ne.s32.totalorder %s4590_s6, %s4030_s28  ;;  %p4034_p1 = scmp.lt.u32.totalorder %s4030_s28, %s4590_s6 }
  0x7a   :  { %p4036_p2 = pnand %p4034_p1, %p4031_p0 }
  0x7c   :  { %4039 = shalt.err (!%p4036_p2)
}
  0x7d   :  { %s4040_s1 = scalar_lea.vmem %s95_s23, 32  ;;  %p4045_p4 = scmp.lt.s32.totalorder %s95_s23, %s95_s23 }
  0x7e   :  { %p4041_p3 = scmp.ne.s32.totalorder %s95_s23, %s4040_s1  ;;  %p4046_p5 = scmp.lt.s32.totalorder %s4040_s1, %s4040_s1 }
  0x80   :  { %p4047_p6 = por %p4046_p5, %p4045_p4 }
  0x82   :  { %p4048_p7 = pnand %p4047_p6, %p4041_p3 }
  0x84   :  { %4051 = shalt.err (!%p4048_p7)
}
  0x85   :  { %97 = dma.hbm_to_vmem [thread:$0]  %s4590_s6, 32, %s95_s23, [#allocation12]  }
  0x86   :  { %s4118_s14 = smov [#allocation16]   ;;  %s4052_s16 = scalar_lea.hbm %s4592_s8, 16 }
  0x87   :  { %s114_s5 = sshll.u32 %s4118_s14, 4  ;;  %p4053_p8 = scmp.ne.s32.totalorder %s4592_s8, %s4052_s16  ;;  %s115_s5 = int_to_ptr.vmem [resolvable:$true] %s114_s5 }
  0x88   :  { %p4056_p9 = scmp.lt.u32.totalorder %s4052_s16, %s4592_s8 }
  0x8a   :  { %p4058_p10 = pnand %p4056_p9, %p4053_p8 }
  0x8c   :  { %4061 = shalt.err (!%p4058_p10)
}
  0x8d   :  { %s4062_s26 = scalar_lea.vmem %s115_s5, 16  ;;  %s4066_s6 = scalar_lea.vmem %s115_s5, 32 }
  0x8e   :  { %p4063_p11 = scmp.ne.s32.totalorder %s115_s5, %s4062_s26  ;;  %p4067_p12 = scmp.lt.s32.totalorder %s115_s5, %s115_s5 }
  0x8f   :  { %p4068_p13 = scmp.lt.s32.totalorder %s4066_s6, %s4062_s26 }
  0x91   :  { %p4069_p0 = por %p4068_p13, %p4067_p12 }
  0x93   :  { %p4070_p1 = pnand %p4069_p0, %p4063_p11 }
  0x95   :  { %4073 = shalt.err (!%p4070_p1)
}
  0x96   :  { %117 = dma.hbm_to_vmem [thread:$0]  %s4592_s8, 16, %s115_s5, [#allocation15]  }
  0x97   :  { %4096 = dma.done.wait [#allocation3], 4096  }
  0x98   :  { %4097 = vsyncadd [#allocation3], 4294963200 }
  0x99   :  { %4098 = dma.done.wait [#allocation6], 8192  }
  0x9a   :  { %4099 = vsyncadd [#allocation6], 4294959104 }
  0x9b   :  { %4100 = dma.done.wait [#allocation9], 4128  }
  0x9c   :  { %4101 = vsyncadd [#allocation9], 4294963168 }
  0x9d   :  { %4102 = dma.done.wait [#allocation12], 64  }
  0x9e   :  { %4103 = vsyncadd [#allocation12], 4294967232 }
  0x9f   :  { %4104 = dma.done.wait [#allocation15], 48  }
  0xa0   :  { %4105 = vsyncadd [#allocation15], 4294967248  ;;  %vm533_vm0 = vcmask 1041408   ;;  %vm436_vm1 = vcmask 31744   ;;  %v275_v0 = vld [vmem:[#allocation11] sm:$0x3] }
  0xa1   :  { %v1438_v1 = vld [vmem:[#allocation13] sm:$0x3]  ;;  %3730 = vmatprep.subr.msk.bf16.mxu1 %vm533_vm0, %v275_v0  ;;  %v535_v2 = vsel %vm533_vm0, %v275_v0, 0  ;;  %v3750_v6 = vld [vmem:[#allocation5 + $0x8] sm:$0xff]   ;;  %v210_v7 = vld [vmem:[#allocation10] sm:$0x3] }
  0xa2   :  { %3732 = vmatprep.subr.msk.bf16.mxu0 %vm533_vm0, %v1438_v1  ;;  %v1696_v3 = vsel %vm533_vm0, %v1438_v1, 0  ;;  %v3748_v4 = vld [vmem:[#allocation5] sm:$0xff]   ;;  %3275 = vmatpush3.bf16.msra.mxu1 %v535_v2  ;;  %v3751_v8 = vld [vmem:[#allocation7 + $0x8] sm:$0xff]   ;;  %v1083_v9 = vsel %vm533_vm0, %v210_v7, 0  ;;  %v3752_v12 = vld [vmem:[#allocation5 + $0x10] sm:$0xff]   ;;  %vm2799_vm2 = vcmask 130048  }
  0xa3   :  { %v3749_v5 = vld [vmem:[#allocation7] sm:$0xff]   ;;  %3407 = vmatpush3.bf16.msra.mxu0 %v1696_v3  ;;  %3276 = vmatprep.mubr.msk.bf16.mxu1 %vm436_vm1, %v3748_v4  ;;  %v3753_v13 = vld [vmem:[#allocation7 + $0x10] sm:$0xff]   ;;  %v3754_v14 = vld [vmem:[#allocation5 + $0x18] sm:$0xff]   ;;  %s4119_s8 = smov [#allocation17]  }
  0xa4   :  { %3408 = vmatprep.mubr.msk.bf16.mxu0 %vm436_vm1, %v3749_v5  ;;  %3731 = vmatprep.subr.msk.bf16.mxu1 %vm533_vm0, %v210_v7  ;;  %v2115_v10 = vld [vmem:[#allocation14] sm:$0x3]  ;;  %v3755_v15 = vld [vmem:[#allocation7 + $0x18] sm:$0xff]   ;;  %v3758_v18 = vld [vmem:[#allocation5 + $0x28] sm:$0xff]   ;;  %s2869_s12 = sshll.u32 %s4119_s8, 4  ;;  %s2870_s12 = int_to_ptr.vmem [resolvable:$true] %s2869_s12 }
  0xa5   :  { %3277 = vmatmul.mubr.msk.bf16.vlgmr.msra.gmra.mrb[0].mxu1 %vm436_vm1, %v3750_v6  ;;  %3733 = vmatprep.subr.msk.bf16.mxu0 %vm533_vm0, %v2115_v10  ;;  %v2373_v11 = vsel %vm533_vm0, %v2115_v10, 0  ;;  %v3756_v16 = vld [vmem:[#allocation5 + $0x20] sm:$0xff]   ;;  %v3759_v19 = vld [vmem:[#allocation7 + $0x28] sm:$0xff]   ;;  %v3760_v20 = vld [vmem:[#allocation5 + $0x30] sm:$0xff]   ;;  %s4074_s27 = scalar_lea.vmem %s2870_s12, 8192  ;;  %p4079_p3 = scmp.lt.s32.totalorder %s2870_s12, %s2870_s12 }
  0xa6   :  { %3409 = vmatmul.mubr.msk.bf16.vlgmr.msra.gmra.mrb[0].mxu0 %vm436_vm1, %v3751_v8  ;;  %3341 = vmatpush3.bf16.msra.mxu1 %v1083_v9  ;;  %v3757_v17 = vld [vmem:[#allocation7 + $0x20] sm:$0xff]   ;;  %v3761_v21 = vld [vmem:[#allocation7 + $0x30] sm:$0xff]   ;;  %v3762_v22 = vld [vmem:[#allocation5 + $0x38] sm:$0xff]   ;;  %p4075_p2 = scmp.ne.s32.totalorder %s2870_s12, %s4074_s27  ;;  %p4080_p4 = scmp.lt.s32.totalorder %s4074_s27, %s4074_s27 }
  0xa7   :  { %3473 = vmatpush3.bf16.msra.mxu0 %v2373_v11  ;;  %3280 = vmatprep.mubr.msk.bf16.mxu1 %vm436_vm1, %v3752_v12  ;;  %v3763_v23 = vld [vmem:[#allocation7 + $0x38] sm:$0xff]   ;;  %v3764_v24 = vld [vmem:[#allocation5 + $0x40] sm:$0xff]   ;;  %v3766_v26 = vld [vmem:[#allocation5 + $0x48] sm:$0xff]  }
  0xa8   :  { %3412 = vmatprep.mubr.msk.bf16.mxu0 %vm436_vm1, %v3753_v13  ;;  %v3765_v25 = vld [vmem:[#allocation7 + $0x40] sm:$0xff]   ;;  %v3767_v27 = vld [vmem:[#allocation7 + $0x48] sm:$0xff]   ;;  %v3768_v28 = vld [vmem:[#allocation5 + $0x50] sm:$0xff]   ;;  %p4081_p5 = por %p4080_p4, %p4079_p3 }
  0xa9   :  { %v3769_v29 = vld [vmem:[#allocation7 + $0x50] sm:$0xff]   ;;  %v3770_v30 = vld [vmem:[#allocation5 + $0x58] sm:$0xff]   ;;  %v3772_v32 = vld [vmem:[#allocation5 + $0x60] sm:$0xff]  }
  0xaa   :  { %v3771_v31 = vld [vmem:[#allocation7 + $0x58] sm:$0xff]   ;;  %v3773_v33 = vld [vmem:[#allocation7 + $0x60] sm:$0xff]   ;;  %v3774_v34 = vld [vmem:[#allocation5 + $0x68] sm:$0xff]   ;;  %p4082_p6 = pnand %p4081_p5, %p4075_p2 }
  0xab   :  { %v3775_v35 = vld [vmem:[#allocation7 + $0x68] sm:$0xff]   ;;  %v3776_v36 = vld [vmem:[#allocation5 + $0x70] sm:$0xff]   ;;  %v3778_v38 = vld [vmem:[#allocation5 + $0x78] sm:$0xff]  }
  0xac   :  { %v3777_v37 = vld [vmem:[#allocation7 + $0x70] sm:$0xff]   ;;  %v3779_v39 = vld [vmem:[#allocation7 + $0x78] sm:$0xff]   ;;  %v3780_v40 = vld [vmem:[#allocation5 + $0x80] sm:$0xff]  }
  0xad   :  { %3281 = vmatmul.mubr.msk.bf16.gmra.mrb[4].mxu1 %vm436_vm1, %v3754_v14  ;;  %v3781_v41 = vld [vmem:[#allocation7 + $0x80] sm:$0xff]   ;;  %v3782_v42 = vld [vmem:[#allocation5 + $0x88] sm:$0xff]   ;;  %v3784_v44 = vld [vmem:[#allocation5 + $0x90] sm:$0xff]  }
  0xae   :  { %3413 = vmatmul.mubr.msk.bf16.gmra.mrb[4].mxu0 %vm436_vm1, %v3755_v15  ;;  %3284 = vmatprep.mubr.msk.bf16.mxu1 %vm436_vm1, %v3756_v16  ;;  %v3783_v43 = vld [vmem:[#allocation7 + $0x88] sm:$0xff]   ;;  %v3785_v45 = vld [vmem:[#allocation7 + $0x90] sm:$0xff]   ;;  %v3786_v46 = vld [vmem:[#allocation5 + $0x98] sm:$0xff]  }
  0xaf   :  { %3416 = vmatprep.mubr.msk.bf16.mxu0 %vm436_vm1, %v3757_v17  ;;  %v3787_v47 = vld [vmem:[#allocation7 + $0x98] sm:$0xff]   ;;  %v3788_v48 = vld [vmem:[#allocation5 + $0xa0] sm:$0xff]   ;;  %v3790_v50 = vld [vmem:[#allocation5 + $0xa8] sm:$0xff]  }
  0xb0   :  { %v3789_v49 = vld [vmem:[#allocation7 + $0xa0] sm:$0xff]   ;;  %v3791_v51 = vld [vmem:[#allocation7 + $0xa8] sm:$0xff]   ;;  %v3792_v52 = vld [vmem:[#allocation5 + $0xb0] sm:$0xff]  }
  0xb1   :  { %v3793_v53 = vld [vmem:[#allocation7 + $0xb0] sm:$0xff]   ;;  %v3794_v54 = vld [vmem:[#allocation5 + $0xb8] sm:$0xff]   ;;  %v3796_v56 = vld [vmem:[#allocation5 + $0xc0] sm:$0xff]  }
  0xb2   :  { %v3795_v55 = vld [vmem:[#allocation7 + $0xb8] sm:$0xff]   ;;  %v3797_v57 = vld [vmem:[#allocation7 + $0xc0] sm:$0xff]   ;;  %v3798_v58 = vld [vmem:[#allocation5 + $0xc8] sm:$0xff]  }
  0xb3   :  { %v3799_v59 = vld [vmem:[#allocation7 + $0xc8] sm:$0xff]   ;;  %v3800_v60 = vld [vmem:[#allocation5 + $0xd0] sm:$0xff]   ;;  %v3802_v62 = vld [vmem:[#allocation5 + $0xd8] sm:$0xff]  }
  0xb4   :  { %v3801_v61 = vld [vmem:[#allocation7 + $0xd0] sm:$0xff]   ;;  %v3803_v63 = vld [vmem:[#allocation7 + $0xd8] sm:$0xff]   ;;  %v3804_v0 = vld [vmem:[#allocation5 + $0xe0] sm:$0xff]  }
  0xb5   :  { %3285 = vmatmul.mubr.msk.bf16.gmra.mrb[8].mxu1 %vm436_vm1, %v3758_v18  ;;  %v3805_v1 = vld [vmem:[#allocation7 + $0xe0] sm:$0xff]   ;;  %v3806_v2 = vld [vmem:[#allocation5 + $0xe8] sm:$0xff]   ;;  %v3808_v4 = vld [vmem:[#allocation5 + $0xf0] sm:$0xff]  }
  0xb6   :  { %3417 = vmatmul.mubr.msk.bf16.gmra.mrb[8].mxu0 %vm436_vm1, %v3759_v19  ;;  %3288 = vmatprep.mubr.msk.bf16.mxu1 %vm436_vm1, %v3760_v20  ;;  %v3807_v3 = vld [vmem:[#allocation7 + $0xe8] sm:$0xff]   ;;  %v3809_v5 = vld [vmem:[#allocation7 + $0xf0] sm:$0xff]   ;;  %v3810_v6 = vld [vmem:[#allocation5 + $0xf8] sm:$0xff]  }
  0xb7   :  { %3420 = vmatprep.mubr.msk.bf16.mxu0 %vm436_vm1, %v3761_v21  ;;  %v3811_v7 = vld [vmem:[#allocation7 + $0xf8] sm:$0xff]   ;;  %v3812_v8 = vld [vmem:[#allocation2] sm:$0xff]   ;;  %v3814_v10 = vld [vmem:[#allocation2 + $0x8] sm:$0xff]  }
  0xb8   :  { %v3813_v9 = vld [vmem:[#allocation8] sm:$0xff]   ;;  %v3815_v11 = vld [vmem:[#allocation8 + $0x8] sm:$0xff]   ;;  %v3816_v12 = vld [vmem:[#allocation2 + $0x10] sm:$0xff]  }
  0xb9   :  { %v3817_v13 = vld [vmem:[#allocation8 + $0x10] sm:$0xff]   ;;  %v3818_v14 = vld [vmem:[#allocation2 + $0x18] sm:$0xff]   ;;  %v3820_v16 = vld [vmem:[#allocation2 + $0x20] sm:$0xff]  }
  0xba   :  { %v3819_v15 = vld [vmem:[#allocation8 + $0x18] sm:$0xff]   ;;  %v3821_v17 = vld [vmem:[#allocation8 + $0x20] sm:$0xff]   ;;  %v3822_v18 = vld [vmem:[#allocation2 + $0x28] sm:$0xff]  }
  0xbb   :  { %v3823_v19 = vld [vmem:[#allocation8 + $0x28] sm:$0xff]   ;;  %v3824_v20 = vld [vmem:[#allocation2 + $0x30] sm:$0xff]  }
  0xbc   :  { %v3825_v21 = vld [vmem:[#allocation8 + $0x30] sm:$0xff]  }
  0xbd   :  { %3289 = vmatmul.mubr.msk.bf16.gmra.mrb[12].mxu1 %vm436_vm1, %v3762_v22  ;;  %v3826_v22 = vld [vmem:[#allocation2 + $0x38] sm:$0xff]  }
  0xbe   :  { %3421 = vmatmul.mubr.msk.bf16.gmra.mrb[12].mxu0 %vm436_vm1, %v3763_v23  ;;  %3292 = vmatprep.mubr.msk.bf16.mxu1 %vm436_vm1, %v3764_v24  ;;  %v3827_v23 = vld [vmem:[#allocation8 + $0x38] sm:$0xff]   ;;  %v3828_v24 = vld [vmem:[#allocation2 + $0x40] sm:$0xff]  }
  0xbf   :  { %3424 = vmatprep.mubr.msk.bf16.mxu0 %vm436_vm1, %v3765_v25  ;;  %v3829_v25 = vld [vmem:[#allocation8 + $0x40] sm:$0xff]  }
  0xc5   :  { %3293 = vmatmul.mubr.msk.bf16.gmra.mrb[16].mxu1 %vm436_vm1, %v3766_v26  ;;  %v3830_v26 = vld [vmem:[#allocation2 + $0x48] sm:$0xff]  }
  0xc6   :  { %3425 = vmatmul.mubr.msk.bf16.gmra.mrb[16].mxu0 %vm436_vm1, %v3767_v27  ;;  %3296 = vmatprep.mubr.msk.bf16.mxu1 %vm436_vm1, %v3768_v28  ;;  %v3831_v27 = vld [vmem:[#allocation8 + $0x48] sm:$0xff]   ;;  %v3832_v28 = vld [vmem:[#allocation2 + $0x50] sm:$0xff]  }
  0xc7   :  { %3428 = vmatprep.mubr.msk.bf16.mxu0 %vm436_vm1, %v3769_v29  ;;  %v3833_v29 = vld [vmem:[#allocation8 + $0x50] sm:$0xff]  }
  0xcd   :  { %3297 = vmatmul.mubr.msk.bf16.gmra.mrb[20].mxu1 %vm436_vm1, %v3770_v30  ;;  %v3834_v30 = vld [vmem:[#allocation2 + $0x58] sm:$0xff]  }
  0xce   :  { %3429 = vmatmul.mubr.msk.bf16.gmra.mrb[20].mxu0 %vm436_vm1, %v3771_v31  ;;  %3300 = vmatprep.mubr.msk.bf16.mxu1 %vm436_vm1, %v3772_v32  ;;  %v3835_v31 = vld [vmem:[#allocation8 + $0x58] sm:$0xff]   ;;  %v3836_v32 = vld [vmem:[#allocation2 + $0x60] sm:$0xff]  }
  0xcf   :  { %3432 = vmatprep.mubr.msk.bf16.mxu0 %vm436_vm1, %v3773_v33  ;;  %v3837_v33 = vld [vmem:[#allocation8 + $0x60] sm:$0xff]  }
  0xd5   :  { %3301 = vmatmul.mubr.msk.bf16.gmra.mrb[24].mxu1 %vm436_vm1, %v3774_v34  ;;  %v3838_v34 = vld [vmem:[#allocation2 + $0x68] sm:$0xff]  }
  0xd6   :  { %3433 = vmatmul.mubr.msk.bf16.gmra.mrb[24].mxu0 %vm436_vm1, %v3775_v35  ;;  %3304 = vmatprep.mubr.msk.bf16.mxu1 %vm436_vm1, %v3776_v36  ;;  %v3839_v35 = vld [vmem:[#allocation8 + $0x68] sm:$0xff]   ;;  %v3840_v36 = vld [vmem:[#allocation2 + $0x70] sm:$0xff]  }
  0xd7   :  { %3436 = vmatprep.mubr.msk.bf16.mxu0 %vm436_vm1, %v3777_v37  ;;  %v3841_v37 = vld [vmem:[#allocation8 + $0x70] sm:$0xff]  }
  0xdd   :  { %3305 = vmatmul.mubr.msk.bf16.gmra.mrb[28].mxu1 %vm436_vm1, %v3778_v38  ;;  %v3842_v38 = vld [vmem:[#allocation2 + $0x78] sm:$0xff]  }
  0xde   :  { %3437 = vmatmul.mubr.msk.bf16.gmra.mrb[28].mxu0 %vm436_vm1, %v3779_v39  ;;  %3308 = vmatprep.mubr.msk.bf16.mxu1 %vm436_vm1, %v3780_v40  ;;  %v3843_v39 = vld [vmem:[#allocation8 + $0x78] sm:$0xff]   ;;  %v3844_v40 = vld [vmem:[#allocation2 + $0x80] sm:$0xff]  }
  0xdf   :  { %3440 = vmatprep.mubr.msk.bf16.mxu0 %vm436_vm1, %v3781_v41  ;;  %v3845_v41 = vld [vmem:[#allocation8 + $0x80] sm:$0xff]  }
  0xe5   :  { %3309 = vmatmul.mubr.msk.bf16.gmra.mrb[32].mxu1 %vm436_vm1, %v3782_v42  ;;  %v3846_v42 = vld [vmem:[#allocation2 + $0x88] sm:$0xff]  }
  0xe6   :  { %3441 = vmatmul.mubr.msk.bf16.gmra.mrb[32].mxu0 %vm436_vm1, %v3783_v43  ;;  %3312 = vmatprep.mubr.msk.bf16.mxu1 %vm436_vm1, %v3784_v44  ;;  %v3847_v43 = vld [vmem:[#allocation8 + $0x88] sm:$0xff]   ;;  %v3848_v44 = vld [vmem:[#allocation2 + $0x90] sm:$0xff]  }
  0xe7   :  { %3444 = vmatprep.mubr.msk.bf16.mxu0 %vm436_vm1, %v3785_v45  ;;  %v3849_v45 = vld [vmem:[#allocation8 + $0x90] sm:$0xff]  }
  0xed   :  { %3313 = vmatmul.mubr.msk.bf16.gmra.mrb[36].mxu1 %vm436_vm1, %v3786_v46  ;;  %v3850_v46 = vld [vmem:[#allocation2 + $0x98] sm:$0xff]  }
  0xee   :  { %3445 = vmatmul.mubr.msk.bf16.gmra.mrb[36].mxu0 %vm436_vm1, %v3787_v47  ;;  %3316 = vmatprep.mubr.msk.bf16.mxu1 %vm436_vm1, %v3788_v48  ;;  %v3851_v47 = vld [vmem:[#allocation8 + $0x98] sm:$0xff]   ;;  %v3852_v48 = vld [vmem:[#allocation2 + $0xa0] sm:$0xff]  }
  0xef   :  { %3448 = vmatprep.mubr.msk.bf16.mxu0 %vm436_vm1, %v3789_v49  ;;  %v3853_v49 = vld [vmem:[#allocation8 + $0xa0] sm:$0xff]  }
  0xf5   :  { %3317 = vmatmul.mubr.msk.bf16.gmra.mrb[40].mxu1 %vm436_vm1, %v3790_v50  ;;  %v3854_v50 = vld [vmem:[#allocation2 + $0xa8] sm:$0xff]  }
  0xf6   :  { %3449 = vmatmul.mubr.msk.bf16.gmra.mrb[40].mxu0 %vm436_vm1, %v3791_v51  ;;  %3320 = vmatprep.mubr.msk.bf16.mxu1 %vm436_vm1, %v3792_v52  ;;  %v3855_v51 = vld [vmem:[#allocation8 + $0xa8] sm:$0xff]   ;;  %v3856_v52 = vld [vmem:[#allocation2 + $0xb0] sm:$0xff]  }
  0xf7   :  { %3452 = vmatprep.mubr.msk.bf16.mxu0 %vm436_vm1, %v3793_v53  ;;  %v3857_v53 = vld [vmem:[#allocation8 + $0xb0] sm:$0xff]  }
  0xfd   :  { %3321 = vmatmul.mubr.msk.bf16.gmra.mrb[44].mxu1 %vm436_vm1, %v3794_v54  ;;  %v3858_v54 = vld [vmem:[#allocation2 + $0xb8] sm:$0xff]  }
  0xfe   :  { %3453 = vmatmul.mubr.msk.bf16.gmra.mrb[44].mxu0 %vm436_vm1, %v3795_v55  ;;  %3324 = vmatprep.mubr.msk.bf16.mxu1 %vm436_vm1, %v3796_v56  ;;  %v3859_v55 = vld [vmem:[#allocation8 + $0xb8] sm:$0xff]   ;;  %v3860_v56 = vld [vmem:[#allocation2 + $0xc0] sm:$0xff]  }
  0xff   :  { %3456 = vmatprep.mubr.msk.bf16.mxu0 %vm436_vm1, %v3797_v57  ;;  %v3861_v57 = vld [vmem:[#allocation8 + $0xc0] sm:$0xff]  }
 0x105   :  { %3325 = vmatmul.mubr.msk.bf16.gmra.mrb[48].mxu1 %vm436_vm1, %v3798_v58  ;;  %v3862_v58 = vld [vmem:[#allocation2 + $0xc8] sm:$0xff]  }
 0x106   :  { %3457 = vmatmul.mubr.msk.bf16.gmra.mrb[48].mxu0 %vm436_vm1, %v3799_v59  ;;  %3328 = vmatprep.mubr.msk.bf16.mxu1 %vm436_vm1, %v3800_v60  ;;  %v3863_v59 = vld [vmem:[#allocation8 + $0xc8] sm:$0xff]   ;;  %v3864_v60 = vld [vmem:[#allocation2 + $0xd0] sm:$0xff]  }
 0x107   :  { %3460 = vmatprep.mubr.msk.bf16.mxu0 %vm436_vm1, %v3801_v61  ;;  %v3865_v61 = vld [vmem:[#allocation8 + $0xd0] sm:$0xff]  }
 0x10d   :  { %3329 = vmatmul.mubr.msk.bf16.gmra.mrb[52].mxu1 %vm436_vm1, %v3802_v62  ;;  %v3866_v62 = vld [vmem:[#allocation2 + $0xd8] sm:$0xff]  }
 0x10e   :  { %3461 = vmatmul.mubr.msk.bf16.gmra.mrb[52].mxu0 %vm436_vm1, %v3803_v63  ;;  %3332 = vmatprep.mubr.msk.bf16.mxu1 %vm436_vm1, %v3804_v0  ;;  %v3867_v63 = vld [vmem:[#allocation8 + $0xd8] sm:$0xff]   ;;  %v3868_v0 = vld [vmem:[#allocation2 + $0xe0] sm:$0xff]  }
 0x10f   :  { %3464 = vmatprep.mubr.msk.bf16.mxu0 %vm436_vm1, %v3805_v1  ;;  %v3869_v1 = vld [vmem:[#allocation8 + $0xe0] sm:$0xff]  }
 0x115   :  { %3333 = vmatmul.mubr.msk.bf16.gmra.mrb[56].mxu1 %vm436_vm1, %v3806_v2  ;;  %v3870_v2 = vld [vmem:[#allocation2 + $0xe8] sm:$0xff]  }
 0x116   :  { %3465 = vmatmul.mubr.msk.bf16.gmra.mrb[56].mxu0 %vm436_vm1, %v3807_v3  ;;  %3336 = vmatprep.mubr.msk.bf16.mxu1 %vm436_vm1, %v3808_v4  ;;  %v3871_v3 = vld [vmem:[#allocation8 + $0xe8] sm:$0xff]   ;;  %v3872_v4 = vld [vmem:[#allocation2 + $0xf0] sm:$0xff]  }
 0x117   :  { %3468 = vmatprep.mubr.msk.bf16.mxu0 %vm436_vm1, %v3809_v5  ;;  %v3873_v5 = vld [vmem:[#allocation8 + $0xf0] sm:$0xff]  }
 0x11d   :  { %3337 = vmatmul.mubr.msk.bf16.gmra.mrb[60].mxu1 %vm436_vm1, %v3810_v6  ;;  %v3874_v6 = vld [vmem:[#allocation2 + $0xf8] sm:$0xff]  }
 0x11e   :  { %3469 = vmatmul.mubr.msk.bf16.gmra.mrb[60].mxu0 %vm436_vm1, %v3811_v7  ;;  %3342 = vmatprep.mubr.msk.bf16.mxu1 %vm436_vm1, %v3812_v8  ;;  %v3875_v7 = vld [vmem:[#allocation8 + $0xf8] sm:$0xff]  }
 0x11f   :  { %3474 = vmatprep.mubr.msk.bf16.mxu0 %vm436_vm1, %v3813_v9 }
 0x125   :  { %3343 = vmatmul.mubr.msk.bf16.vlgmr.msra.gmra.mrb[0].mxu1 %vm436_vm1, %v3814_v10  ;;  %v4442_v10 = vld [vmem:[#allocation16] ss:$0 sm:$0xff] }
 0x126   :  { %3475 = vmatmul.mubr.msk.bf16.vlgmr.msra.gmra.mrb[0].mxu0 %vm436_vm1, %v3815_v11  ;;  %3346 = vmatprep.mubr.msk.bf16.mxu1 %vm436_vm1, %v3816_v12 }
 0x127   :  { %3478 = vmatprep.mubr.msk.bf16.mxu0 %vm436_vm1, %v3817_v13 }
 0x12d   :  { %3347 = vmatmul.mubr.msk.bf16.gmra.mrb[4].mxu1 %vm436_vm1, %v3818_v14 }
 0x12e   :  { %3479 = vmatmul.mubr.msk.bf16.gmra.mrb[4].mxu0 %vm436_vm1, %v3819_v15  ;;  %3350 = vmatprep.mubr.msk.bf16.mxu1 %vm436_vm1, %v3820_v16 }
 0x12f   :  { %3482 = vmatprep.mubr.msk.bf16.mxu0 %vm436_vm1, %v3821_v17 }
 0x135   :  { %3351 = vmatmul.mubr.msk.bf16.gmra.mrb[8].mxu1 %vm436_vm1, %v3822_v18 }
 0x136   :  { %3483 = vmatmul.mubr.msk.bf16.gmra.mrb[8].mxu0 %vm436_vm1, %v3823_v19  ;;  %3354 = vmatprep.mubr.msk.bf16.mxu1 %vm436_vm1, %v3824_v20 }
 0x137   :  { %3486 = vmatprep.mubr.msk.bf16.mxu0 %vm436_vm1, %v3825_v21 }
 0x13d   :  { %3355 = vmatmul.mubr.msk.bf16.gmra.mrb[12].mxu1 %vm436_vm1, %v3826_v22 }
 0x13e   :  { %3487 = vmatmul.mubr.msk.bf16.gmra.mrb[12].mxu0 %vm436_vm1, %v3827_v23  ;;  %3358 = vmatprep.mubr.msk.bf16.mxu1 %vm436_vm1, %v3828_v24 }
 0x13f   :  { %3490 = vmatprep.mubr.msk.bf16.mxu0 %vm436_vm1, %v3829_v25 }
 0x145   :  { %3359 = vmatmul.mubr.msk.bf16.gmra.mrb[16].mxu1 %vm436_vm1, %v3830_v26 }
 0x146   :  { %3491 = vmatmul.mubr.msk.bf16.gmra.mrb[16].mxu0 %vm436_vm1, %v3831_v27  ;;  %3362 = vmatprep.mubr.msk.bf16.mxu1 %vm436_vm1, %v3832_v28 }
 0x147   :  { %3494 = vmatprep.mubr.msk.bf16.mxu0 %vm436_vm1, %v3833_v29 }
 0x14d   :  { %3363 = vmatmul.mubr.msk.bf16.gmra.mrb[20].mxu1 %vm436_vm1, %v3834_v30 }
 0x14e   :  { %3495 = vmatmul.mubr.msk.bf16.gmra.mrb[20].mxu0 %vm436_vm1, %v3835_v31  ;;  %3366 = vmatprep.mubr.msk.bf16.mxu1 %vm436_vm1, %v3836_v32 }
 0x14f   :  { %3498 = vmatprep.mubr.msk.bf16.mxu0 %vm436_vm1, %v3837_v33 }
 0x155   :  { %3367 = vmatmul.mubr.msk.bf16.gmra.mrb[24].mxu1 %vm436_vm1, %v3838_v34 }
 0x156   :  { %3499 = vmatmul.mubr.msk.bf16.gmra.mrb[24].mxu0 %vm436_vm1, %v3839_v35  ;;  %3370 = vmatprep.mubr.msk.bf16.mxu1 %vm436_vm1, %v3840_v36 }
 0x157   :  { %3502 = vmatprep.mubr.msk.bf16.mxu0 %vm436_vm1, %v3841_v37 }
 0x15d   :  { %3371 = vmatmul.mubr.msk.bf16.gmra.mrb[28].mxu1 %vm436_vm1, %v3842_v38 }
 0x15e   :  { %3503 = vmatmul.mubr.msk.bf16.gmra.mrb[28].mxu0 %vm436_vm1, %v3843_v39  ;;  %3374 = vmatprep.mubr.msk.bf16.mxu1 %vm436_vm1, %v3844_v40 }
 0x15f   :  { %3506 = vmatprep.mubr.msk.bf16.mxu0 %vm436_vm1, %v3845_v41 }
 0x165   :  { %3375 = vmatmul.mubr.msk.bf16.gmra.mrb[32].mxu1 %vm436_vm1, %v3846_v42 }
 0x166   :  { %3507 = vmatmul.mubr.msk.bf16.gmra.mrb[32].mxu0 %vm436_vm1, %v3847_v43  ;;  %3378 = vmatprep.mubr.msk.bf16.mxu1 %vm436_vm1, %v3848_v44 }
 0x167   :  { %3510 = vmatprep.mubr.msk.bf16.mxu0 %vm436_vm1, %v3849_v45 }
 0x16d   :  { %3379 = vmatmul.mubr.msk.bf16.gmra.mrb[36].mxu1 %vm436_vm1, %v3850_v46 }
 0x16e   :  { %3511 = vmatmul.mubr.msk.bf16.gmra.mrb[36].mxu0 %vm436_vm1, %v3851_v47  ;;  %3382 = vmatprep.mubr.msk.bf16.mxu1 %vm436_vm1, %v3852_v48 }
 0x16f   :  { %3514 = vmatprep.mubr.msk.bf16.mxu0 %vm436_vm1, %v3853_v49 }
 0x175   :  { %3383 = vmatmul.mubr.msk.bf16.gmra.mrb[40].mxu1 %vm436_vm1, %v3854_v50 }
 0x176   :  { %3515 = vmatmul.mubr.msk.bf16.gmra.mrb[40].mxu0 %vm436_vm1, %v3855_v51  ;;  %3386 = vmatprep.mubr.msk.bf16.mxu1 %vm436_vm1, %v3856_v52 }
 0x177   :  { %3518 = vmatprep.mubr.msk.bf16.mxu0 %vm436_vm1, %v3857_v53 }
 0x17d   :  { %3387 = vmatmul.mubr.msk.bf16.gmra.mrb[44].mxu1 %vm436_vm1, %v3858_v54 }
 0x17e   :  { %3519 = vmatmul.mubr.msk.bf16.gmra.mrb[44].mxu0 %vm436_vm1, %v3859_v55  ;;  %3390 = vmatprep.mubr.msk.bf16.mxu1 %vm436_vm1, %v3860_v56 }
 0x17f   :  { %3522 = vmatprep.mubr.msk.bf16.mxu0 %vm436_vm1, %v3861_v57 }
 0x185   :  { %3391 = vmatmul.mubr.msk.bf16.gmra.mrb[48].mxu1 %vm436_vm1, %v3862_v58 }
 0x186   :  { %3523 = vmatmul.mubr.msk.bf16.gmra.mrb[48].mxu0 %vm436_vm1, %v3863_v59  ;;  %3394 = vmatprep.mubr.msk.bf16.mxu1 %vm436_vm1, %v3864_v60 }
 0x187   :  { %3526 = vmatprep.mubr.msk.bf16.mxu0 %vm436_vm1, %v3865_v61 }
 0x18d   :  { %3395 = vmatmul.mubr.msk.bf16.gmra.mrb[52].mxu1 %vm436_vm1, %v3866_v62 }
 0x18e   :  { %3527 = vmatmul.mubr.msk.bf16.gmra.mrb[52].mxu0 %vm436_vm1, %v3867_v63  ;;  %3398 = vmatprep.mubr.msk.bf16.mxu1 %vm436_vm1, %v3868_v0 }
 0x18f   :  { %3530 = vmatprep.mubr.msk.bf16.mxu0 %vm436_vm1, %v3869_v1 }
 0x195   :  { %3399 = vmatmul.mubr.msk.bf16.gmra.mrb[56].mxu1 %vm436_vm1, %v3870_v2 }
 0x196   :  { %3531 = vmatmul.mubr.msk.bf16.gmra.mrb[56].mxu0 %vm436_vm1, %v3871_v3  ;;  %3402 = vmatprep.mubr.msk.bf16.mxu1 %vm436_vm1, %v3872_v4 }
 0x197   :  { %3534 = vmatprep.mubr.msk.bf16.mxu0 %vm436_vm1, %v3873_v5 }
 0x19d   :  { %3403 = vmatmul.mubr.msk.bf16.gmra.mrb[60].mxu1 %vm436_vm1, %v3874_v6 }
 0x19e   :  { %3535 = vmatmul.mubr.msk.bf16.gmra.mrb[60].mxu0 %vm436_vm1, %v3875_v7 }
 0x1f8   :  { %v3344_v8 = vpop.f32.mrb[0].mxu1 }
 0x1f9   :  { %v3476_v9 = vpop.f32.mrb[0].mxu0  ;;  %v1119_v11 = vpop.f32.mrb[1].mxu1 }
 0x1fa   :  { %v3538_v12 = vadd.f32 %v3476_v9, %v3344_v8  ;;  %v2409_v13 = vpop.f32.mrb[1].mxu0  ;;  %v3345_v14 = vpop.f32.mrb[2].mxu1 }
 0x1fb   :  { %v3539_v15 = vadd.f32 %v2409_v13, %v1119_v11  ;;  %v3477_v16 = vpop.f32.mrb[2].mxu0  ;;  %v1122_v17 = vpop.f32.mrb[3].mxu1 }
 0x1fc   :  { %v2737_v18 = vadd.f32 %v3538_v12, %v4442_v10  ;;  %v3540_v19 = vadd.f32 %v3477_v16, %v3345_v14  ;;  %v2412_v20 = vpop.f32.mrb[3].mxu0 }
 0x1fd   :  { %v2735_v21 = vadd.f32 %v3539_v15, %v4442_v10  ;;  %v3541_v22 = vadd.f32 %v2412_v20, %v1122_v17 }
 0x1fe   :  { %2802 = vst.msk [vmem:[#allocation17 + $0x10] sm:$0xff] %vm2799_vm2, %v2737_v18  ;;  %v2738_v23 = vadd.f32 %v3540_v19, %v4442_v10 }
 0x1ff   :  { %2800 = vst.msk [vmem:[#allocation17] sm:$0xff] %vm2799_vm2, %v2735_v21  ;;  %v2736_v24 = vadd.f32 %v3541_v22, %v4442_v10 }
 0x200   :  { %2803 = vst.msk [vmem:[#allocation17 + $0x18] sm:$0xff] %vm2799_vm2, %v2738_v23  ;;  %v3348_v25 = vpop.f32.mrb[4].mxu1 }
 0x201   :  { %2801 = vst.msk [vmem:[#allocation17 + $0x8] sm:$0xff] %vm2799_vm2, %v2736_v24  ;;  %v3480_v26 = vpop.f32.mrb[4].mxu0  ;;  %v1135_v27 = vpop.f32.mrb[5].mxu1 }
 0x202   :  { %v3542_v28 = vadd.f32 %v3480_v26, %v3348_v25  ;;  %v2425_v29 = vpop.f32.mrb[5].mxu0  ;;  %v3349_v30 = vpop.f32.mrb[6].mxu1 }
 0x203   :  { %v3543_v31 = vadd.f32 %v2425_v29, %v1135_v27  ;;  %v3481_v32 = vpop.f32.mrb[6].mxu0  ;;  %v1138_v33 = vpop.f32.mrb[7].mxu1 }
 0x204   :  { %v2741_v34 = vadd.f32 %v3542_v28, %v4442_v10  ;;  %v3544_v35 = vadd.f32 %v3481_v32, %v3349_v30  ;;  %v2428_v36 = vpop.f32.mrb[7].mxu0 }
 0x205   :  { %v2739_v37 = vadd.f32 %v3543_v31, %v4442_v10  ;;  %v3545_v38 = vadd.f32 %v2428_v36, %v1138_v33 }
 0x206   :  { %2806 = vst.msk [vmem:[#allocation17 + $0x30] sm:$0xff] %vm2799_vm2, %v2741_v34  ;;  %v2742_v39 = vadd.f32 %v3544_v35, %v4442_v10 }
 0x207   :  { %2804 = vst.msk [vmem:[#allocation17 + $0x20] sm:$0xff] %vm2799_vm2, %v2739_v37  ;;  %v2740_v40 = vadd.f32 %v3545_v38, %v4442_v10 }
 0x208   :  { %2807 = vst.msk [vmem:[#allocation17 + $0x38] sm:$0xff] %vm2799_vm2, %v2742_v39  ;;  %v3352_v41 = vpop.f32.mrb[8].mxu1 }
 0x209   :  { %2805 = vst.msk [vmem:[#allocation17 + $0x28] sm:$0xff] %vm2799_vm2, %v2740_v40  ;;  %v3484_v42 = vpop.f32.mrb[8].mxu0  ;;  %v1151_v43 = vpop.f32.mrb[9].mxu1 }
 0x20a   :  { %v3546_v44 = vadd.f32 %v3484_v42, %v3352_v41  ;;  %v2441_v45 = vpop.f32.mrb[9].mxu0  ;;  %v3353_v46 = vpop.f32.mrb[10].mxu1 }
 0x20b   :  { %v3547_v47 = vadd.f32 %v2441_v45, %v1151_v43  ;;  %v3485_v48 = vpop.f32.mrb[10].mxu0  ;;  %v1154_v49 = vpop.f32.mrb[11].mxu1 }
 0x20c   :  { %v2745_v50 = vadd.f32 %v3546_v44, %v4442_v10  ;;  %v3548_v51 = vadd.f32 %v3485_v48, %v3353_v46  ;;  %v2444_v52 = vpop.f32.mrb[11].mxu0 }
 0x20d   :  { %v2743_v53 = vadd.f32 %v3547_v47, %v4442_v10  ;;  %v3549_v54 = vadd.f32 %v2444_v52, %v1154_v49 }
 0x20e   :  { %2810 = vst.msk [vmem:[#allocation17 + $0x50] sm:$0xff] %vm2799_vm2, %v2745_v50  ;;  %v2746_v55 = vadd.f32 %v3548_v51, %v4442_v10 }
 0x20f   :  { %2808 = vst.msk [vmem:[#allocation17 + $0x40] sm:$0xff] %vm2799_vm2, %v2743_v53  ;;  %v2744_v56 = vadd.f32 %v3549_v54, %v4442_v10 }
 0x210   :  { %2811 = vst.msk [vmem:[#allocation17 + $0x58] sm:$0xff] %vm2799_vm2, %v2746_v55  ;;  %v3356_v57 = vpop.f32.mrb[12].mxu1 }
 0x211   :  { %2809 = vst.msk [vmem:[#allocation17 + $0x48] sm:$0xff] %vm2799_vm2, %v2744_v56  ;;  %v3488_v58 = vpop.f32.mrb[12].mxu0  ;;  %v1167_v59 = vpop.f32.mrb[13].mxu1 }
 0x212   :  { %v3550_v60 = vadd.f32 %v3488_v58, %v3356_v57  ;;  %v2457_v61 = vpop.f32.mrb[13].mxu0  ;;  %v3357_v62 = vpop.f32.mrb[14].mxu1 }
 0x213   :  { %v3551_v63 = vadd.f32 %v2457_v61, %v1167_v59  ;;  %v3489_v0 = vpop.f32.mrb[14].mxu0  ;;  %v1170_v1 = vpop.f32.mrb[15].mxu1 }
 0x214   :  { %v2749_v2 = vadd.f32 %v3550_v60, %v4442_v10  ;;  %v3552_v3 = vadd.f32 %v3489_v0, %v3357_v62  ;;  %v2460_v4 = vpop.f32.mrb[15].mxu0 }
 0x215   :  { %v2747_v5 = vadd.f32 %v3551_v63, %v4442_v10  ;;  %v3553_v6 = vadd.f32 %v2460_v4, %v1170_v1 }
 0x216   :  { %2814 = vst.msk [vmem:[#allocation17 + $0x70] sm:$0xff] %vm2799_vm2, %v2749_v2  ;;  %v2750_v7 = vadd.f32 %v3552_v3, %v4442_v10 }
 0x217   :  { %2812 = vst.msk [vmem:[#allocation17 + $0x60] sm:$0xff] %vm2799_vm2, %v2747_v5  ;;  %v2748_v8 = vadd.f32 %v3553_v6, %v4442_v10 }
 0x218   :  { %2815 = vst.msk [vmem:[#allocation17 + $0x78] sm:$0xff] %vm2799_vm2, %v2750_v7  ;;  %v3360_v9 = vpop.f32.mrb[16].mxu1 }
 0x219   :  { %2813 = vst.msk [vmem:[#allocation17 + $0x68] sm:$0xff] %vm2799_vm2, %v2748_v8  ;;  %v3492_v11 = vpop.f32.mrb[16].mxu0  ;;  %v1183_v12 = vpop.f32.mrb[17].mxu1 }
 0x21a   :  { %v3554_v13 = vadd.f32 %v3492_v11, %v3360_v9  ;;  %v2473_v14 = vpop.f32.mrb[17].mxu0  ;;  %v3361_v15 = vpop.f32.mrb[18].mxu1 }
 0x21b   :  { %v3555_v16 = vadd.f32 %v2473_v14, %v1183_v12  ;;  %v3493_v17 = vpop.f32.mrb[18].mxu0  ;;  %v1186_v18 = vpop.f32.mrb[19].mxu1 }
 0x21c   :  { %v2753_v19 = vadd.f32 %v3554_v13, %v4442_v10  ;;  %v3556_v20 = vadd.f32 %v3493_v17, %v3361_v15  ;;  %v2476_v21 = vpop.f32.mrb[19].mxu0 }
 0x21d   :  { %v2751_v22 = vadd.f32 %v3555_v16, %v4442_v10  ;;  %v3557_v23 = vadd.f32 %v2476_v21, %v1186_v18 }
 0x21e   :  { %2818 = vst.msk [vmem:[#allocation17 + $0x90] sm:$0xff] %vm2799_vm2, %v2753_v19  ;;  %v2754_v24 = vadd.f32 %v3556_v20, %v4442_v10 }
 0x21f   :  { %2816 = vst.msk [vmem:[#allocation17 + $0x80] sm:$0xff] %vm2799_vm2, %v2751_v22  ;;  %v2752_v25 = vadd.f32 %v3557_v23, %v4442_v10 }
 0x220   :  { %2819 = vst.msk [vmem:[#allocation17 + $0x98] sm:$0xff] %vm2799_vm2, %v2754_v24  ;;  %v3364_v26 = vpop.f32.mrb[20].mxu1 }
 0x221   :  { %2817 = vst.msk [vmem:[#allocation17 + $0x88] sm:$0xff] %vm2799_vm2, %v2752_v25  ;;  %v3496_v27 = vpop.f32.mrb[20].mxu0  ;;  %v1199_v28 = vpop.f32.mrb[21].mxu1 }
 0x222   :  { %v3558_v29 = vadd.f32 %v3496_v27, %v3364_v26  ;;  %v2489_v30 = vpop.f32.mrb[21].mxu0  ;;  %v3365_v31 = vpop.f32.mrb[22].mxu1 }
 0x223   :  { %v3559_v32 = vadd.f32 %v2489_v30, %v1199_v28  ;;  %v3497_v33 = vpop.f32.mrb[22].mxu0  ;;  %v1202_v34 = vpop.f32.mrb[23].mxu1 }
 0x224   :  { %v2757_v35 = vadd.f32 %v3558_v29, %v4442_v10  ;;  %v3560_v36 = vadd.f32 %v3497_v33, %v3365_v31  ;;  %v2492_v37 = vpop.f32.mrb[23].mxu0 }
 0x225   :  { %v2755_v38 = vadd.f32 %v3559_v32, %v4442_v10  ;;  %v3561_v39 = vadd.f32 %v2492_v37, %v1202_v34 }
 0x226   :  { %2822 = vst.msk [vmem:[#allocation17 + $0xb0] sm:$0xff] %vm2799_vm2, %v2757_v35  ;;  %v2758_v40 = vadd.f32 %v3560_v36, %v4442_v10 }
 0x227   :  { %2820 = vst.msk [vmem:[#allocation17 + $0xa0] sm:$0xff] %vm2799_vm2, %v2755_v38  ;;  %v2756_v41 = vadd.f32 %v3561_v39, %v4442_v10 }
 0x228   :  { %2823 = vst.msk [vmem:[#allocation17 + $0xb8] sm:$0xff] %vm2799_vm2, %v2758_v40  ;;  %v3368_v42 = vpop.f32.mrb[24].mxu1 }
 0x229   :  { %2821 = vst.msk [vmem:[#allocation17 + $0xa8] sm:$0xff] %vm2799_vm2, %v2756_v41  ;;  %v3500_v43 = vpop.f32.mrb[24].mxu0  ;;  %v1215_v44 = vpop.f32.mrb[25].mxu1 }
 0x22a   :  { %v3562_v45 = vadd.f32 %v3500_v43, %v3368_v42  ;;  %v2505_v46 = vpop.f32.mrb[25].mxu0  ;;  %v3369_v47 = vpop.f32.mrb[26].mxu1 }
 0x22b   :  { %v3563_v48 = vadd.f32 %v2505_v46, %v1215_v44  ;;  %v3501_v49 = vpop.f32.mrb[26].mxu0  ;;  %v1218_v50 = vpop.f32.mrb[27].mxu1 }
 0x22c   :  { %v2761_v51 = vadd.f32 %v3562_v45, %v4442_v10  ;;  %v3564_v52 = vadd.f32 %v3501_v49, %v3369_v47  ;;  %v2508_v53 = vpop.f32.mrb[27].mxu0 }
 0x22d   :  { %v2759_v54 = vadd.f32 %v3563_v48, %v4442_v10  ;;  %v3565_v55 = vadd.f32 %v2508_v53, %v1218_v50 }
 0x22e   :  { %2826 = vst.msk [vmem:[#allocation17 + $0xd0] sm:$0xff] %vm2799_vm2, %v2761_v51  ;;  %v2762_v56 = vadd.f32 %v3564_v52, %v4442_v10 }
 0x22f   :  { %2824 = vst.msk [vmem:[#allocation17 + $0xc0] sm:$0xff] %vm2799_vm2, %v2759_v54  ;;  %v2760_v57 = vadd.f32 %v3565_v55, %v4442_v10 }
 0x230   :  { %2827 = vst.msk [vmem:[#allocation17 + $0xd8] sm:$0xff] %vm2799_vm2, %v2762_v56  ;;  %v3372_v58 = vpop.f32.mrb[28].mxu1 }
 0x231   :  { %2825 = vst.msk [vmem:[#allocation17 + $0xc8] sm:$0xff] %vm2799_vm2, %v2760_v57  ;;  %v3504_v59 = vpop.f32.mrb[28].mxu0  ;;  %v1231_v60 = vpop.f32.mrb[29].mxu1 }
 0x232   :  { %v3566_v61 = vadd.f32 %v3504_v59, %v3372_v58  ;;  %v2521_v62 = vpop.f32.mrb[29].mxu0  ;;  %v3373_v63 = vpop.f32.mrb[30].mxu1 }
 0x233   :  { %v3567_v0 = vadd.f32 %v2521_v62, %v1231_v60  ;;  %v3505_v1 = vpop.f32.mrb[30].mxu0  ;;  %v1234_v2 = vpop.f32.mrb[31].mxu1 }
 0x234   :  { %v2765_v3 = vadd.f32 %v3566_v61, %v4442_v10  ;;  %v3568_v4 = vadd.f32 %v3505_v1, %v3373_v63  ;;  %v2524_v5 = vpop.f32.mrb[31].mxu0 }
 0x235   :  { %v2763_v6 = vadd.f32 %v3567_v0, %v4442_v10  ;;  %v3569_v7 = vadd.f32 %v2524_v5, %v1234_v2 }
 0x236   :  { %2830 = vst.msk [vmem:[#allocation17 + $0xf0] sm:$0xff] %vm2799_vm2, %v2765_v3  ;;  %v2766_v8 = vadd.f32 %v3568_v4, %v4442_v10 }
 0x237   :  { %2828 = vst.msk [vmem:[#allocation17 + $0xe0] sm:$0xff] %vm2799_vm2, %v2763_v6  ;;  %v2764_v9 = vadd.f32 %v3569_v7, %v4442_v10 }
 0x238   :  { %2831 = vst.msk [vmem:[#allocation17 + $0xf8] sm:$0xff] %vm2799_vm2, %v2766_v8  ;;  %v3376_v11 = vpop.f32.mrb[32].mxu1 }
 0x239   :  { %2829 = vst.msk [vmem:[#allocation17 + $0xe8] sm:$0xff] %vm2799_vm2, %v2764_v9  ;;  %v3508_v12 = vpop.f32.mrb[32].mxu0  ;;  %v1247_v13 = vpop.f32.mrb[33].mxu1 }
 0x23a   :  { %v3570_v14 = vadd.f32 %v3508_v12, %v3376_v11  ;;  %v2537_v15 = vpop.f32.mrb[33].mxu0  ;;  %v3377_v16 = vpop.f32.mrb[34].mxu1 }
 0x23b   :  { %v3571_v17 = vadd.f32 %v2537_v15, %v1247_v13  ;;  %v3509_v18 = vpop.f32.mrb[34].mxu0  ;;  %v1250_v19 = vpop.f32.mrb[35].mxu1 }
 0x23c   :  { %v2769_v20 = vadd.f32 %v3570_v14, %v4442_v10  ;;  %v3572_v21 = vadd.f32 %v3509_v18, %v3377_v16  ;;  %v2540_v22 = vpop.f32.mrb[35].mxu0 }
 0x23d   :  { %v2767_v23 = vadd.f32 %v3571_v17, %v4442_v10  ;;  %v3573_v24 = vadd.f32 %v2540_v22, %v1250_v19 }
 0x23e   :  { %2834 = vst.msk [vmem:[#allocation17 + $0x110] sm:$0xff] %vm2799_vm2, %v2769_v20  ;;  %v2770_v25 = vadd.f32 %v3572_v21, %v4442_v10 }
 0x23f   :  { %2832 = vst.msk [vmem:[#allocation17 + $0x100] sm:$0xff] %vm2799_vm2, %v2767_v23  ;;  %v2768_v26 = vadd.f32 %v3573_v24, %v4442_v10 }
 0x240   :  { %2835 = vst.msk [vmem:[#allocation17 + $0x118] sm:$0xff] %vm2799_vm2, %v2770_v25  ;;  %v3380_v27 = vpop.f32.mrb[36].mxu1 }
 0x241   :  { %2833 = vst.msk [vmem:[#allocation17 + $0x108] sm:$0xff] %vm2799_vm2, %v2768_v26  ;;  %v3512_v28 = vpop.f32.mrb[36].mxu0  ;;  %v1263_v29 = vpop.f32.mrb[37].mxu1 }
 0x242   :  { %v3574_v30 = vadd.f32 %v3512_v28, %v3380_v27  ;;  %v2553_v31 = vpop.f32.mrb[37].mxu0  ;;  %v3381_v32 = vpop.f32.mrb[38].mxu1 }
 0x243   :  { %v3575_v33 = vadd.f32 %v2553_v31, %v1263_v29  ;;  %v3513_v34 = vpop.f32.mrb[38].mxu0  ;;  %v1266_v35 = vpop.f32.mrb[39].mxu1 }
 0x244   :  { %v2773_v36 = vadd.f32 %v3574_v30, %v4442_v10  ;;  %v3576_v37 = vadd.f32 %v3513_v34, %v3381_v32  ;;  %v2556_v38 = vpop.f32.mrb[39].mxu0 }
 0x245   :  { %v2771_v39 = vadd.f32 %v3575_v33, %v4442_v10  ;;  %v3577_v40 = vadd.f32 %v2556_v38, %v1266_v35 }
 0x246   :  { %2838 = vst.msk [vmem:[#allocation17 + $0x130] sm:$0xff] %vm2799_vm2, %v2773_v36  ;;  %v2774_v41 = vadd.f32 %v3576_v37, %v4442_v10 }
 0x247   :  { %2836 = vst.msk [vmem:[#allocation17 + $0x120] sm:$0xff] %vm2799_vm2, %v2771_v39  ;;  %v2772_v42 = vadd.f32 %v3577_v40, %v4442_v10 }
 0x248   :  { %2839 = vst.msk [vmem:[#allocation17 + $0x138] sm:$0xff] %vm2799_vm2, %v2774_v41  ;;  %v3384_v43 = vpop.f32.mrb[40].mxu1 }
 0x249   :  { %2837 = vst.msk [vmem:[#allocation17 + $0x128] sm:$0xff] %vm2799_vm2, %v2772_v42  ;;  %v3516_v44 = vpop.f32.mrb[40].mxu0  ;;  %v1279_v45 = vpop.f32.mrb[41].mxu1 }
 0x24a   :  { %v3578_v46 = vadd.f32 %v3516_v44, %v3384_v43  ;;  %v2569_v47 = vpop.f32.mrb[41].mxu0  ;;  %v3385_v48 = vpop.f32.mrb[42].mxu1 }
 0x24b   :  { %v3579_v49 = vadd.f32 %v2569_v47, %v1279_v45  ;;  %v3517_v50 = vpop.f32.mrb[42].mxu0  ;;  %v1282_v51 = vpop.f32.mrb[43].mxu1 }
 0x24c   :  { %v2777_v52 = vadd.f32 %v3578_v46, %v4442_v10  ;;  %v3580_v53 = vadd.f32 %v3517_v50, %v3385_v48  ;;  %v2572_v54 = vpop.f32.mrb[43].mxu0 }
 0x24d   :  { %v2775_v55 = vadd.f32 %v3579_v49, %v4442_v10  ;;  %v3581_v56 = vadd.f32 %v2572_v54, %v1282_v51 }
 0x24e   :  { %2842 = vst.msk [vmem:[#allocation17 + $0x150] sm:$0xff] %vm2799_vm2, %v2777_v52  ;;  %v2778_v57 = vadd.f32 %v3580_v53, %v4442_v10 }
 0x24f   :  { %2840 = vst.msk [vmem:[#allocation17 + $0x140] sm:$0xff] %vm2799_vm2, %v2775_v55  ;;  %v2776_v58 = vadd.f32 %v3581_v56, %v4442_v10 }
 0x250   :  { %2843 = vst.msk [vmem:[#allocation17 + $0x158] sm:$0xff] %vm2799_vm2, %v2778_v57  ;;  %v3388_v59 = vpop.f32.mrb[44].mxu1 }
 0x251   :  { %2841 = vst.msk [vmem:[#allocation17 + $0x148] sm:$0xff] %vm2799_vm2, %v2776_v58  ;;  %v3520_v60 = vpop.f32.mrb[44].mxu0  ;;  %v1295_v61 = vpop.f32.mrb[45].mxu1 }
 0x252   :  { %v3582_v62 = vadd.f32 %v3520_v60, %v3388_v59  ;;  %v2585_v63 = vpop.f32.mrb[45].mxu0  ;;  %v3389_v0 = vpop.f32.mrb[46].mxu1 }
 0x253   :  { %v3583_v1 = vadd.f32 %v2585_v63, %v1295_v61  ;;  %v3521_v2 = vpop.f32.mrb[46].mxu0  ;;  %v1298_v3 = vpop.f32.mrb[47].mxu1 }
 0x254   :  { %v2781_v4 = vadd.f32 %v3582_v62, %v4442_v10  ;;  %v3584_v5 = vadd.f32 %v3521_v2, %v3389_v0  ;;  %v2588_v6 = vpop.f32.mrb[47].mxu0 }
 0x255   :  { %v2779_v7 = vadd.f32 %v3583_v1, %v4442_v10  ;;  %v3585_v8 = vadd.f32 %v2588_v6, %v1298_v3 }
 0x256   :  { %2846 = vst.msk [vmem:[#allocation17 + $0x170] sm:$0xff] %vm2799_vm2, %v2781_v4  ;;  %v2782_v9 = vadd.f32 %v3584_v5, %v4442_v10 }
 0x257   :  { %2844 = vst.msk [vmem:[#allocation17 + $0x160] sm:$0xff] %vm2799_vm2, %v2779_v7  ;;  %v2780_v11 = vadd.f32 %v3585_v8, %v4442_v10 }
 0x258   :  { %2847 = vst.msk [vmem:[#allocation17 + $0x178] sm:$0xff] %vm2799_vm2, %v2782_v9  ;;  %v3392_v12 = vpop.f32.mrb[48].mxu1 }
 0x259   :  { %2845 = vst.msk [vmem:[#allocation17 + $0x168] sm:$0xff] %vm2799_vm2, %v2780_v11  ;;  %v3524_v13 = vpop.f32.mrb[48].mxu0  ;;  %v1311_v14 = vpop.f32.mrb[49].mxu1 }
 0x25a   :  { %v3586_v15 = vadd.f32 %v3524_v13, %v3392_v12  ;;  %v2601_v16 = vpop.f32.mrb[49].mxu0  ;;  %v3393_v17 = vpop.f32.mrb[50].mxu1 }
 0x25b   :  { %v3587_v18 = vadd.f32 %v2601_v16, %v1311_v14  ;;  %v3525_v19 = vpop.f32.mrb[50].mxu0  ;;  %v1314_v20 = vpop.f32.mrb[51].mxu1 }
 0x25c   :  { %v2785_v21 = vadd.f32 %v3586_v15, %v4442_v10  ;;  %v3588_v22 = vadd.f32 %v3525_v19, %v3393_v17  ;;  %v2604_v23 = vpop.f32.mrb[51].mxu0 }
 0x25d   :  { %v2783_v24 = vadd.f32 %v3587_v18, %v4442_v10  ;;  %v3589_v25 = vadd.f32 %v2604_v23, %v1314_v20 }
 0x25e   :  { %2850 = vst.msk [vmem:[#allocation17 + $0x190] sm:$0xff] %vm2799_vm2, %v2785_v21  ;;  %v2786_v26 = vadd.f32 %v3588_v22, %v4442_v10 }
 0x25f   :  { %2848 = vst.msk [vmem:[#allocation17 + $0x180] sm:$0xff] %vm2799_vm2, %v2783_v24  ;;  %v2784_v27 = vadd.f32 %v3589_v25, %v4442_v10 }
 0x260   :  { %2851 = vst.msk [vmem:[#allocation17 + $0x198] sm:$0xff] %vm2799_vm2, %v2786_v26  ;;  %v3396_v28 = vpop.f32.mrb[52].mxu1 }
 0x261   :  { %2849 = vst.msk [vmem:[#allocation17 + $0x188] sm:$0xff] %vm2799_vm2, %v2784_v27  ;;  %v3528_v29 = vpop.f32.mrb[52].mxu0  ;;  %v1327_v30 = vpop.f32.mrb[53].mxu1 }
 0x262   :  { %v3590_v31 = vadd.f32 %v3528_v29, %v3396_v28  ;;  %v2617_v32 = vpop.f32.mrb[53].mxu0  ;;  %v3397_v33 = vpop.f32.mrb[54].mxu1 }
 0x263   :  { %v3591_v34 = vadd.f32 %v2617_v32, %v1327_v30  ;;  %v3529_v35 = vpop.f32.mrb[54].mxu0  ;;  %v1330_v36 = vpop.f32.mrb[55].mxu1 }
 0x264   :  { %v2789_v37 = vadd.f32 %v3590_v31, %v4442_v10  ;;  %v3592_v38 = vadd.f32 %v3529_v35, %v3397_v33  ;;  %v2620_v39 = vpop.f32.mrb[55].mxu0 }
 0x265   :  { %v2787_v40 = vadd.f32 %v3591_v34, %v4442_v10  ;;  %v3593_v41 = vadd.f32 %v2620_v39, %v1330_v36 }
 0x266   :  { %2854 = vst.msk [vmem:[#allocation17 + $0x1b0] sm:$0xff] %vm2799_vm2, %v2789_v37  ;;  %v2790_v42 = vadd.f32 %v3592_v38, %v4442_v10 }
 0x267   :  { %2852 = vst.msk [vmem:[#allocation17 + $0x1a0] sm:$0xff] %vm2799_vm2, %v2787_v40  ;;  %v2788_v43 = vadd.f32 %v3593_v41, %v4442_v10 }
 0x268   :  { %2855 = vst.msk [vmem:[#allocation17 + $0x1b8] sm:$0xff] %vm2799_vm2, %v2790_v42  ;;  %v3400_v44 = vpop.f32.mrb[56].mxu1 }
 0x269   :  { %2853 = vst.msk [vmem:[#allocation17 + $0x1a8] sm:$0xff] %vm2799_vm2, %v2788_v43  ;;  %v3532_v45 = vpop.f32.mrb[56].mxu0  ;;  %v1343_v46 = vpop.f32.mrb[57].mxu1 }
 0x26a   :  { %v3594_v47 = vadd.f32 %v3532_v45, %v3400_v44  ;;  %v2633_v48 = vpop.f32.mrb[57].mxu0  ;;  %v3401_v49 = vpop.f32.mrb[58].mxu1 }
 0x26b   :  { %v3595_v50 = vadd.f32 %v2633_v48, %v1343_v46  ;;  %v3533_v51 = vpop.f32.mrb[58].mxu0  ;;  %v1346_v52 = vpop.f32.mrb[59].mxu1 }
 0x26c   :  { %v2793_v53 = vadd.f32 %v3594_v47, %v4442_v10  ;;  %v3596_v54 = vadd.f32 %v3533_v51, %v3401_v49  ;;  %v2636_v55 = vpop.f32.mrb[59].mxu0 }
 0x26d   :  { %v2791_v56 = vadd.f32 %v3595_v50, %v4442_v10  ;;  %v3597_v57 = vadd.f32 %v2636_v55, %v1346_v52 }
 0x26e   :  { %2858 = vst.msk [vmem:[#allocation17 + $0x1d0] sm:$0xff] %vm2799_vm2, %v2793_v53  ;;  %v2794_v58 = vadd.f32 %v3596_v54, %v4442_v10 }
 0x26f   :  { %2856 = vst.msk [vmem:[#allocation17 + $0x1c0] sm:$0xff] %vm2799_vm2, %v2791_v56  ;;  %v2792_v59 = vadd.f32 %v3597_v57, %v4442_v10 }
 0x270   :  { %2859 = vst.msk [vmem:[#allocation17 + $0x1d8] sm:$0xff] %vm2799_vm2, %v2794_v58  ;;  %v3404_v60 = vpop.f32.mrb[60].mxu1 }
 0x271   :  { %2857 = vst.msk [vmem:[#allocation17 + $0x1c8] sm:$0xff] %vm2799_vm2, %v2792_v59  ;;  %v3536_v61 = vpop.f32.mrb[60].mxu0  ;;  %v1359_v62 = vpop.f32.mrb[61].mxu1 }
 0x272   :  { %v3598_v63 = vadd.f32 %v3536_v61, %v3404_v60  ;;  %v2649_v0 = vpop.f32.mrb[61].mxu0  ;;  %v3405_v1 = vpop.f32.mrb[62].mxu1 }
 0x273   :  { %v3599_v2 = vadd.f32 %v2649_v0, %v1359_v62  ;;  %v3537_v3 = vpop.f32.mrb[62].mxu0  ;;  %v1362_v4 = vpop.f32.mrb[63].mxu1 }
 0x274   :  { %v2797_v5 = vadd.f32 %v3598_v63, %v4442_v10  ;;  %v3600_v6 = vadd.f32 %v3537_v3, %v3405_v1  ;;  %v2652_v7 = vpop.f32.mrb[63].mxu0 }
 0x275   :  { %v2795_v8 = vadd.f32 %v3599_v2, %v4442_v10  ;;  %v3601_v9 = vadd.f32 %v2652_v7, %v1362_v4 }
 0x276   :  { %2862 = vst.msk [vmem:[#allocation17 + $0x1f0] sm:$0xff] %vm2799_vm2, %v2797_v5  ;;  %v2798_v11 = vadd.f32 %v3600_v6, %v4442_v10 }
 0x277   :  { %2860 = vst.msk [vmem:[#allocation17 + $0x1e0] sm:$0xff] %vm2799_vm2, %v2795_v8  ;;  %v2796_v12 = vadd.f32 %v3601_v9, %v4442_v10 }
 0x278   :  { %2863 = vst.msk [vmem:[#allocation17 + $0x1f8] sm:$0xff] %vm2799_vm2, %v2798_v11 }
 0x279   :  { %2861 = vst.msk [vmem:[#allocation17 + $0x1e8] sm:$0xff] %vm2799_vm2, %v2796_v12 }
 0x27a   :  { %4085 = shalt.err (!%p4082_p6)
}
 0x27b   :  { %s4086_s21 = scalar_lea.hbm %s4593_s9, 8192 }
 0x27c   :  { %p4087_p7 = scmp.ne.s32.totalorder %s4593_s9, %s4086_s21  ;;  %p4090_p8 = scmp.lt.u32.totalorder %s4086_s21, %s4593_s9 }
 0x27e   :  { %p4092_p9 = pnand %p4090_p8, %p4087_p7 }
 0x280   :  { %4095 = shalt.err (!%p4092_p9)
}
 0x281   :  { %s4120_s29 = smov 128   ;;  %s4121_s30 = smov 8  }
 0x282   :  { %2875 = dma.vmem_to_hbm [thread:$0]  %s2870_s12, 8192, %s4593_s9, [#allocation4], %s4120_s29, %s4120_s29, %s4121_s30  }
 0x283   :  { %4106 = dma.done.wait [#allocation4], 8192  }
 0x284   :  { %4107 = vsyncadd [#allocation4], 4294959104 }
 0x285   :  { %2879 = vsyncpa [#allocation3], 1 }
 0x286   :  { %2880 = vsyncpa [#allocation6], 1 }
 0x287   :  { %2881 = vsyncpa [#allocation9], 1 }
 0x288   :  { %2882 = vsyncpa [#allocation12], 1 }
 0x289   :  { %2883 = vsyncpa [#allocation15], 1 }
 0x28a   :  { %2884 = vsyncpa [#allocation4], 1 }

</bundles_post_ra>
